<compile_context>
chip_gen: v7x
topology: tpu7x:2x2x1
jax: 0.10.0
libtpu: 0.0.40
codegen_flags: <defaults>
</compile_context>

<pallas_src>
import math
from functools import partial

import jax
import jax.numpy as jnp
from jax.experimental import pallas as pl
from jax.experimental.pallas import tpu as pltpu


# ---------------------------------------------------------------------------
# Fused kernel: PE add + all encoder blocks, one batch element per program
# ---------------------------------------------------------------------------

def _layer_norm(y, g, b, eps=1e-5):
    mu = jnp.mean(y, axis=-1, keepdims=True)
    # variance as E[x^2] - mu^2 -> one fewer cross-lane reduction
    var = jnp.mean(y * y, axis=-1, keepdims=True) - mu * mu
    return (y - mu) * jax.lax.rsqrt(var + eps) * g + b


def _encoder_fused_kernel(x_ref, pe_ref,
                          wqkv_ref, bqkv_ref, wo_ref, bo_ref,
                          ln1g_ref, ln1b_ref,
                          w1_ref, b1_ref, w2_ref, b2_ref,
                          ln2g_ref, ln2b_ref,
                          o_ref, *, num_heads, num_blocks):
    S, D = pe_ref.shape
    Dh = D // num_heads

    # positional-encoding add (dropout == identity at inference)
    x = x_ref[0] + pe_ref[...]                                    # (S, D)

    for l in range(num_blocks):                                   # static unroll
        # ---- multi-head self-attention (fused QKV projection) ----
        qkv = jnp.dot(x, wqkv_ref[l],
                      preferred_element_type=jnp.float32) + bqkv_ref[l]
        # 1/sqrt(Dh) is pre-folded into the Q columns of wqkv/bqkv host-side.
        q = qkv[:, 0 * D:1 * D].reshape(S, num_heads, Dh)
        k = qkv[:, 1 * D:2 * D].reshape(S, num_heads, Dh)
        v = qkv[:, 2 * D:3 * D].reshape(S, num_heads, Dh)

        s = jnp.einsum('qhd,khd->hqk', q, k,
                       preferred_element_type=jnp.float32)        # (H, S, S)
        s = s - jnp.max(s, axis=-1, keepdims=True)
        p = jnp.exp(s)
        p = p * pl.reciprocal(jnp.sum(p, axis=-1, keepdims=True), approx=True)
        attn = jnp.einsum('hqk,khd->qhd', p, v,
                          preferred_element_type=jnp.float32).reshape(S, D)
        attn = jnp.dot(attn, wo_ref[l],
                       preferred_element_type=jnp.float32) + bo_ref[l]

        # residual + LayerNorm 1
        x = _layer_norm(x + attn, ln1g_ref[l], ln1b_ref[l])

        # ---- feed-forward ----
        h1 = jnp.maximum(
            jnp.dot(x, w1_ref[l], preferred_element_type=jnp.float32)
            + b1_ref[l], 0.0)
        h2 = jnp.dot(h1, w2_ref[l],
                     preferred_element_type=jnp.float32) + b2_ref[l]

        # residual + LayerNorm 2
        x = _layer_norm(x + h2, ln2g_ref[l], ln2b_ref[l])

    o_ref[0] = x


# ---------------------------------------------------------------------------
# Wrapper: single pallas_call, grid over batch (parallel -> v7x 2 TCs)
# ---------------------------------------------------------------------------

_WEIGHT_NAMES = ('wqkv', 'bqkv', 'wo', 'bo', 'ln1g', 'ln1b',
                 'w1', 'b1', 'w2', 'b2', 'ln2g', 'ln2b')


def encoder_forward(x, pe, params, num_heads):
    B, S, D = x.shape
    num_blocks = params['wqkv'].shape[0]
    weights = [params[n] for n in _WEIGHT_NAMES]

    x_spec = pl.BlockSpec((1, S, D), lambda b: (b, 0, 0))
    pe_spec = pl.BlockSpec((S, D), lambda b: (0, 0))
    # full (stacked) weight arrays, same block for every grid step -> DMA'd once
    w_specs = [pl.BlockSpec(w.shape, lambda b: (0, 0, 0)) for w in weights]

    return pl.pallas_call(
        partial(_encoder_fused_kernel, num_heads=num_heads,
                num_blocks=num_blocks),
        out_shape=jax.ShapeDtypeStruct((B, S, D), x.dtype),
        grid=(B,),
        in_specs=[x_spec, pe_spec] + w_specs,
        out_specs=pl.BlockSpec((1, S, D), lambda b: (b, 0, 0)),
        compiler_params=pltpu.CompilerParams(
            dimension_semantics=("parallel",)),
    )(x, pe, *weights)


# ---------------------------------------------------------------------------
# Parameter / constant construction (deterministic, in-script)
# ---------------------------------------------------------------------------

def sinusoidal_pe(seq_len, d_model):
    pos = jnp.arange(seq_len, dtype=jnp.float32)[:, None]
    div = jnp.exp(jnp.arange(0, d_model, 2, dtype=jnp.float32)
                  * (-math.log(10000.0) / d_model))
    pe = jnp.zeros((seq_len, d_model), jnp.float32)
    pe = pe.at[:, 0::2].set(jnp.sin(pos * div))
    pe = pe.at[:, 1::2].set(jnp.cos(pos * div))
    return pe


def _linear_init(key, fan_in, fan_out):
    # mimics torch.nn.Linear default: U(-1/sqrt(fan_in), 1/sqrt(fan_in))
    lim = 1.0 / math.sqrt(fan_in)
    kw, kb = jax.random.split(key)
    w = jax.random.uniform(kw, (fan_in, fan_out), jnp.float32, -lim, lim)
    b = jax.random.uniform(kb, (1, fan_out), jnp.float32, -lim, lim)
    return w, b


def make_block_params(key, d_model, d_ff, num_heads):
    ks = jax.random.split(key, 6)
    wq, bq = _linear_init(ks[0], d_model, d_model)
    wk, bk = _linear_init(ks[1], d_model, d_model)
    wv, bv = _linear_init(ks[2], d_model, d_model)
    wo, bo = _linear_init(ks[3], d_model, d_model)
    w1, b1 = _linear_init(ks[4], d_model, d_ff)
    w2, b2 = _linear_init(ks[5], d_ff, d_model)
    # fuse QKV; fold 1/sqrt(Dh) into the Q projection (scores unchanged)
    scale = 1.0 / math.sqrt(d_model // num_heads)
    wqkv = jnp.concatenate([wq * scale, wk, wv], axis=1)          # (D, 3D)
    bqkv = jnp.concatenate([bq * scale, bk, bv], axis=1)          # (1, 3D)
    ones = jnp.ones((1, d_model), jnp.float32)
    zeros = jnp.zeros((1, d_model), jnp.float32)
    return dict(wqkv=wqkv, bqkv=bqkv, wo=wo, bo=bo,
                ln1g=ones, ln1b=zeros, w1=w1, b1=b1, w2=w2, b2=b2,
                ln2g=ones, ln2b=zeros)


def stack_block_params(block_param_list):
    return {k: jnp.stack([p[k] for p in block_param_list], axis=0)
            for k in block_param_list[0]}


# ---------------------------------------------------------------------------
# Main
# ---------------------------------------------------------------------------

if __name__ == "__main__":
    headDimension = 32      # model dim D
    numberHeads = 4
    numberEncoderBlocks = 2
    dropout = 0.1           # identity at inference
    B, S = 2, 8

    key = jax.random.PRNGKey(0)
    kx, kparams = jax.random.split(key)
    x = jax.random.normal(kx, (B, S, headDimension), jnp.float32)

    pe = sinusoidal_pe(S, headDimension)
    block_keys = jax.random.split(kparams, numberEncoderBlocks)
    params = stack_block_params(
        [make_block_params(k, headDimension, 4 * headDimension, numberHeads)
         for k in block_keys])

    out = encoder_forward(x, pe, params, numberHeads)
    jax.block_until_ready(out)
    assert out.shape == (B, S, headDimension) and out.dtype == jnp.float32
    print("KERNEL_OK")
</pallas_src>

<mosaic_0001>
module attributes {stable_mosaic.version = 11 : i64} {
  func.func @_encoder_fused_kernel(%arg0: i32, %arg1: memref<1x8x32xf32, #tpu.memory_space<vmem>>, %arg2: memref<8x32xf32, #tpu.memory_space<vmem>>, %arg3: memref<2x32x96xf32, #tpu.memory_space<vmem>>, %arg4: memref<2x1x96xf32, #tpu.memory_space<vmem>>, %arg5: memref<2x32x32xf32, #tpu.memory_space<vmem>>, %arg6: memref<2x1x32xf32, #tpu.memory_space<vmem>>, %arg7: memref<2x1x32xf32, #tpu.memory_space<vmem>>, %arg8: memref<2x1x32xf32, #tpu.memory_space<vmem>>, %arg9: memref<2x32x128xf32, #tpu.memory_space<vmem>>, %arg10: memref<2x1x128xf32, #tpu.memory_space<vmem>>, %arg11: memref<2x128x32xf32, #tpu.memory_space<vmem>>, %arg12: memref<2x1x32xf32, #tpu.memory_space<vmem>>, %arg13: memref<2x1x32xf32, #tpu.memory_space<vmem>>, %arg14: memref<2x1x32xf32, #tpu.memory_space<vmem>>, %arg15: memref<1x8x32xf32, #tpu.memory_space<vmem>>) attributes {dimension_semantics = [#tpu.dimension_semantics<parallel>], iteration_bounds = array<i64: 2>, scalar_prefetch = 0 : i64, scratch_operands = 0 : i64, tpu.core_type = #tpu.core_type<tc>, window_params = [{transform_indices = @transform_0, window_bounds = array<i64: 1, 8, 32>}, {pipeline_mode = #tpu.pipeline_mode<synchronous>, transform_indices = @transform_1, window_bounds = array<i64: 8, 32>}, {pipeline_mode = #tpu.pipeline_mode<synchronous>, transform_indices = @transform_2, window_bounds = array<i64: 2, 32, 96>}, {pipeline_mode = #tpu.pipeline_mode<synchronous>, transform_indices = @transform_3, window_bounds = array<i64: 2, 1, 96>}, {pipeline_mode = #tpu.pipeline_mode<synchronous>, transform_indices = @transform_4, window_bounds = array<i64: 2, 32, 32>}, {pipeline_mode = #tpu.pipeline_mode<synchronous>, transform_indices = @transform_5, window_bounds = array<i64: 2, 1, 32>}, {pipeline_mode = #tpu.pipeline_mode<synchronous>, transform_indices = @transform_6, window_bounds = array<i64: 2, 1, 32>}, {pipeline_mode = #tpu.pipeline_mode<synchronous>, transform_indices = @transform_7, window_bounds = array<i64: 2, 1, 32>}, {pipeline_mode = #tpu.pipeline_mode<synchronous>, transform_indices = @transform_8, window_bounds = array<i64: 2, 32, 128>}, {pipeline_mode = #tpu.pipeline_mode<synchronous>, transform_indices = @transform_9, window_bounds = array<i64: 2, 1, 128>}, {pipeline_mode = #tpu.pipeline_mode<synchronous>, transform_indices = @transform_10, window_bounds = array<i64: 2, 128, 32>}, {pipeline_mode = #tpu.pipeline_mode<synchronous>, transform_indices = @transform_11, window_bounds = array<i64: 2, 1, 32>}, {pipeline_mode = #tpu.pipeline_mode<synchronous>, transform_indices = @transform_12, window_bounds = array<i64: 2, 1, 32>}, {pipeline_mode = #tpu.pipeline_mode<synchronous>, transform_indices = @transform_13, window_bounds = array<i64: 2, 1, 32>}, {transform_indices = @transform_14, window_bounds = array<i64: 1, 8, 32>}]} {
    %c0 = arith.constant 0 : index
    %c0_0 = arith.constant 0 : index
    %c0_1 = arith.constant 0 : index
    %0 = vector.load %arg1[%c0, %c0_0, %c0_1] : memref<1x8x32xf32, #tpu.memory_space<vmem>>, vector<1x8x32xf32>
    %1 = vector.shape_cast %0 : vector<1x8x32xf32> to vector<8x32xf32>
    %c0_2 = arith.constant 0 : index
    %c0_3 = arith.constant 0 : index
    %2 = vector.load %arg2[%c0_2, %c0_3] : memref<8x32xf32, #tpu.memory_space<vmem>>, vector<8x32xf32>
    %3 = arith.addf %1, %2 : vector<8x32xf32>
    %c0_4 = arith.constant 0 : index
    %c0_5 = arith.constant 0 : index
    %c0_6 = arith.constant 0 : index
    %4 = vector.load %arg3[%c0_4, %c0_5, %c0_6] : memref<2x32x96xf32, #tpu.memory_space<vmem>>, vector<1x32x96xf32>
    %5 = vector.shape_cast %4 : vector<1x32x96xf32> to vector<32x96xf32>
    %cst = arith.constant dense<0.000000e+00> : vector<8x96xf32>
    %6 = tpu.matmul %3, %5, %cst {dimension_numbers = #tpu.dot_dimension_numbers<[1], [0], [0], [1], [0, 0, 1, 1], [], []>} : vector<8x32xf32>, vector<32x96xf32>, vector<8x96xf32> -> vector<8x96xf32>
    %c0_7 = arith.constant 0 : index
    %c0_8 = arith.constant 0 : index
    %c0_9 = arith.constant 0 : index
    %7 = vector.load %arg4[%c0_7, %c0_8, %c0_9] : memref<2x1x96xf32, #tpu.memory_space<vmem>>, vector<1x1x96xf32>
    %8 = vector.shape_cast %7 : vector<1x1x96xf32> to vector<1x96xf32>
    %9 = vector.broadcast %8 : vector<1x96xf32> to vector<8x96xf32>
    %10 = arith.addf %6, %9 : vector<8x96xf32>
    %11 = vector.extract_strided_slice %10 {offsets = [0, 0], sizes = [8, 32], strides = [1, 1]} : vector<8x96xf32> to vector<8x32xf32>
    %12 = vector.shape_cast %11 : vector<8x32xf32> to vector<8x4x8xf32>
    %13 = vector.extract_strided_slice %10 {offsets = [0, 32], sizes = [8, 32], strides = [1, 1]} : vector<8x96xf32> to vector<8x32xf32>
    %14 = vector.shape_cast %13 : vector<8x32xf32> to vector<8x4x8xf32>
    %15 = vector.extract_strided_slice %10 {offsets = [0, 64], sizes = [8, 32], strides = [1, 1]} : vector<8x96xf32> to vector<8x32xf32>
    %16 = vector.shape_cast %15 : vector<8x32xf32> to vector<8x4x8xf32>
    "tpu.trace_start"() <{level = 10 : i32, message = "qhd,khd->hqk"}> : () -> ()
    %cst_10 = arith.constant dense<0.000000e+00> : vector<4x8x8xf32>
    %17 = tpu.matmul %12, %14, %cst_10 {dimension_numbers = #tpu.dot_dimension_numbers<[2], [2], [0], [0], [0, 1, 0, 0, 1, 0], [1], [1]>} : vector<8x4x8xf32>, vector<8x4x8xf32>, vector<4x8x8xf32> -> vector<4x8x8xf32>
    "tpu.trace_stop"() : () -> ()
    %cst_11 = arith.constant dense<0xFF800000> : vector<4x8xf32>
    %18 = vector.multi_reduction <maximumf>, %17, %cst_11 [2] : vector<4x8x8xf32> to vector<4x8xf32>
    %19 = vector.shape_cast %18 : vector<4x8xf32> to vector<4x8x1xf32>
    %20 = vector.broadcast %19 : vector<4x8x1xf32> to vector<4x8x8xf32>
    %21 = arith.subf %17, %20 : vector<4x8x8xf32>
    %22 = math.exp %21 : vector<4x8x8xf32>
    %cst_12 = arith.constant dense<0.000000e+00> : vector<4x8xf32>
    %23 = vector.multi_reduction <add>, %22, %cst_12 [2] : vector<4x8x8xf32> to vector<4x8xf32>
    %24 = vector.shape_cast %23 : vector<4x8xf32> to vector<4x8x1xf32>
    %25 = tpu.reciprocal %24 {approx = true} : vector<4x8x1xf32> -> vector<4x8x1xf32>
    %26 = vector.broadcast %25 : vector<4x8x1xf32> to vector<4x8x8xf32>
    %27 = arith.mulf %22, %26 : vector<4x8x8xf32>
    "tpu.trace_start"() <{level = 10 : i32, message = "hqk,khd->qhd"}> : () -> ()
    %cst_13 = arith.constant dense<0.000000e+00> : vector<4x8x8xf32>
    %28 = tpu.matmul %16, %27, %cst_13 {dimension_numbers = #tpu.dot_dimension_numbers<[0], [2], [2], [1], [0, 1, 0, 2, 1, 1], [1], [0]>} : vector<8x4x8xf32>, vector<4x8x8xf32>, vector<4x8x8xf32> -> vector<4x8x8xf32>
    %29 = tpu.transpose %28, [2, 0, 1] : vector<4x8x8xf32> -> vector<8x4x8xf32>
    "tpu.trace_stop"() : () -> ()
    %30 = vector.shape_cast %29 : vector<8x4x8xf32> to vector<8x32xf32>
    %c0_14 = arith.constant 0 : index
    %c0_15 = arith.constant 0 : index
    %c0_16 = arith.constant 0 : index
    %31 = vector.load %arg5[%c0_14, %c0_15, %c0_16] : memref<2x32x32xf32, #tpu.memory_space<vmem>>, vector<1x32x32xf32>
    %32 = vector.shape_cast %31 : vector<1x32x32xf32> to vector<32x32xf32>
    %cst_17 = arith.constant dense<0.000000e+00> : vector<8x32xf32>
    %33 = tpu.matmul %30, %32, %cst_17 {dimension_numbers = #tpu.dot_dimension_numbers<[1], [0], [0], [1], [0, 0, 1, 1], [], []>} : vector<8x32xf32>, vector<32x32xf32>, vector<8x32xf32> -> vector<8x32xf32>
    %c0_18 = arith.constant 0 : index
    %c0_19 = arith.constant 0 : index
    %c0_20 = arith.constant 0 : index
    %34 = vector.load %arg6[%c0_18, %c0_19, %c0_20] : memref<2x1x32xf32, #tpu.memory_space<vmem>>, vector<1x1x32xf32>
    %35 = vector.shape_cast %34 : vector<1x1x32xf32> to vector<1x32xf32>
    %36 = vector.broadcast %35 : vector<1x32xf32> to vector<8x32xf32>
    %37 = arith.addf %33, %36 : vector<8x32xf32>
    %38 = arith.addf %3, %37 : vector<8x32xf32>
    %c0_21 = arith.constant 0 : index
    %c0_22 = arith.constant 0 : index
    %c0_23 = arith.constant 0 : index
    %39 = vector.load %arg7[%c0_21, %c0_22, %c0_23] : memref<2x1x32xf32, #tpu.memory_space<vmem>>, vector<1x1x32xf32>
    %40 = vector.shape_cast %39 : vector<1x1x32xf32> to vector<1x32xf32>
    %c0_24 = arith.constant 0 : index
    %c0_25 = arith.constant 0 : index
    %c0_26 = arith.constant 0 : index
    %41 = vector.load %arg8[%c0_24, %c0_25, %c0_26] : memref<2x1x32xf32, #tpu.memory_space<vmem>>, vector<1x1x32xf32>
    %42 = vector.shape_cast %41 : vector<1x1x32xf32> to vector<1x32xf32>
    %cst_27 = arith.constant dense<0.000000e+00> : vector<8xf32>
    %43 = vector.multi_reduction <add>, %38, %cst_27 [1] : vector<8x32xf32> to vector<8xf32>
    %44 = vector.shape_cast %43 : vector<8xf32> to vector<8x1xf32>
    %cst_28 = arith.constant 3.200000e+01 : f32
    %45 = vector.broadcast %cst_28 : f32 to vector<8x1xf32>
    %46 = arith.divf %44, %45 : vector<8x1xf32>
    %47 = arith.mulf %38, %38 : vector<8x32xf32>
    %cst_29 = arith.constant dense<0.000000e+00> : vector<8xf32>
    %48 = vector.multi_reduction <add>, %47, %cst_29 [1] : vector<8x32xf32> to vector<8xf32>
    %49 = vector.shape_cast %48 : vector<8xf32> to vector<8x1xf32>
    %cst_30 = arith.constant 3.200000e+01 : f32
    %50 = vector.broadcast %cst_30 : f32 to vector<8x1xf32>
    %51 = arith.divf %49, %50 : vector<8x1xf32>
    %52 = arith.mulf %46, %46 : vector<8x1xf32>
    %53 = arith.subf %51, %52 : vector<8x1xf32>
    %54 = vector.broadcast %46 : vector<8x1xf32> to vector<8x32xf32>
    %55 = arith.subf %38, %54 : vector<8x32xf32>
    %cst_31 = arith.constant 9.99999974E-6 : f32
    %56 = vector.broadcast %cst_31 : f32 to vector<8x1xf32>
    %57 = arith.addf %53, %56 : vector<8x1xf32>
    %58 = math.rsqrt %57 : vector<8x1xf32>
    %59 = vector.broadcast %58 : vector<8x1xf32> to vector<8x32xf32>
    %60 = arith.mulf %55, %59 : vector<8x32xf32>
    %61 = vector.broadcast %40 : vector<1x32xf32> to vector<8x32xf32>
    %62 = arith.mulf %60, %61 : vector<8x32xf32>
    %63 = vector.broadcast %42 : vector<1x32xf32> to vector<8x32xf32>
    %64 = arith.addf %62, %63 : vector<8x32xf32>
    %c0_32 = arith.constant 0 : index
    %c0_33 = arith.constant 0 : index
    %c0_34 = arith.constant 0 : index
    %65 = vector.load %arg9[%c0_32, %c0_33, %c0_34] : memref<2x32x128xf32, #tpu.memory_space<vmem>>, vector<1x32x128xf32>
    %66 = vector.shape_cast %65 : vector<1x32x128xf32> to vector<32x128xf32>
    %cst_35 = arith.constant dense<0.000000e+00> : vector<8x128xf32>
    %67 = tpu.matmul %64, %66, %cst_35 {dimension_numbers = #tpu.dot_dimension_numbers<[1], [0], [0], [1], [0, 0, 1, 1], [], []>} : vector<8x32xf32>, vector<32x128xf32>, vector<8x128xf32> -> vector<8x128xf32>
    %c0_36 = arith.constant 0 : index
    %c0_37 = arith.constant 0 : index
    %c0_38 = arith.constant 0 : index
    %68 = vector.load %arg10[%c0_36, %c0_37, %c0_38] : memref<2x1x128xf32, #tpu.memory_space<vmem>>, vector<1x1x128xf32>
    %69 = vector.shape_cast %68 : vector<1x1x128xf32> to vector<1x128xf32>
    %70 = vector.broadcast %69 : vector<1x128xf32> to vector<8x128xf32>
    %71 = arith.addf %67, %70 : vector<8x128xf32>
    %cst_39 = arith.constant 0.000000e+00 : f32
    %72 = vector.broadcast %cst_39 : f32 to vector<8x128xf32>
    %73 = arith.maximumf %71, %72 : vector<8x128xf32>
    %c0_40 = arith.constant 0 : index
    %c0_41 = arith.constant 0 : index
    %c0_42 = arith.constant 0 : index
    %74 = vector.load %arg11[%c0_40, %c0_41, %c0_42] : memref<2x128x32xf32, #tpu.memory_space<vmem>>, vector<1x128x32xf32>
    %75 = vector.shape_cast %74 : vector<1x128x32xf32> to vector<128x32xf32>
    %cst_43 = arith.constant dense<0.000000e+00> : vector<8x32xf32>
    %76 = tpu.matmul %73, %75, %cst_43 {dimension_numbers = #tpu.dot_dimension_numbers<[1], [0], [0], [1], [0, 0, 1, 1], [], []>} : vector<8x128xf32>, vector<128x32xf32>, vector<8x32xf32> -> vector<8x32xf32>
    %c0_44 = arith.constant 0 : index
    %c0_45 = arith.constant 0 : index
    %c0_46 = arith.constant 0 : index
    %77 = vector.load %arg12[%c0_44, %c0_45, %c0_46] : memref<2x1x32xf32, #tpu.memory_space<vmem>>, vector<1x1x32xf32>
    %78 = vector.shape_cast %77 : vector<1x1x32xf32> to vector<1x32xf32>
    %79 = vector.broadcast %78 : vector<1x32xf32> to vector<8x32xf32>
    %80 = arith.addf %76, %79 : vector<8x32xf32>
    %81 = arith.addf %64, %80 : vector<8x32xf32>
    %c0_47 = arith.constant 0 : index
    %c0_48 = arith.constant 0 : index
    %c0_49 = arith.constant 0 : index
    %82 = vector.load %arg13[%c0_47, %c0_48, %c0_49] : memref<2x1x32xf32, #tpu.memory_space<vmem>>, vector<1x1x32xf32>
    %83 = vector.shape_cast %82 : vector<1x1x32xf32> to vector<1x32xf32>
    %c0_50 = arith.constant 0 : index
    %c0_51 = arith.constant 0 : index
    %c0_52 = arith.constant 0 : index
    %84 = vector.load %arg14[%c0_50, %c0_51, %c0_52] : memref<2x1x32xf32, #tpu.memory_space<vmem>>, vector<1x1x32xf32>
    %85 = vector.shape_cast %84 : vector<1x1x32xf32> to vector<1x32xf32>
    %cst_53 = arith.constant dense<0.000000e+00> : vector<8xf32>
    %86 = vector.multi_reduction <add>, %81, %cst_53 [1] : vector<8x32xf32> to vector<8xf32>
    %87 = vector.shape_cast %86 : vector<8xf32> to vector<8x1xf32>
    %cst_54 = arith.constant 3.200000e+01 : f32
    %88 = vector.broadcast %cst_54 : f32 to vector<8x1xf32>
    %89 = arith.divf %87, %88 : vector<8x1xf32>
    %90 = arith.mulf %81, %81 : vector<8x32xf32>
    %cst_55 = arith.constant dense<0.000000e+00> : vector<8xf32>
    %91 = vector.multi_reduction <add>, %90, %cst_55 [1] : vector<8x32xf32> to vector<8xf32>
    %92 = vector.shape_cast %91 : vector<8xf32> to vector<8x1xf32>
    %cst_56 = arith.constant 3.200000e+01 : f32
    %93 = vector.broadcast %cst_56 : f32 to vector<8x1xf32>
    %94 = arith.divf %92, %93 : vector<8x1xf32>
    %95 = arith.mulf %89, %89 : vector<8x1xf32>
    %96 = arith.subf %94, %95 : vector<8x1xf32>
    %97 = vector.broadcast %89 : vector<8x1xf32> to vector<8x32xf32>
    %98 = arith.subf %81, %97 : vector<8x32xf32>
    %cst_57 = arith.constant 9.99999974E-6 : f32
    %99 = vector.broadcast %cst_57 : f32 to vector<8x1xf32>
    %100 = arith.addf %96, %99 : vector<8x1xf32>
    %101 = math.rsqrt %100 : vector<8x1xf32>
    %102 = vector.broadcast %101 : vector<8x1xf32> to vector<8x32xf32>
    %103 = arith.mulf %98, %102 : vector<8x32xf32>
    %104 = vector.broadcast %83 : vector<1x32xf32> to vector<8x32xf32>
    %105 = arith.mulf %103, %104 : vector<8x32xf32>
    %106 = vector.broadcast %85 : vector<1x32xf32> to vector<8x32xf32>
    %107 = arith.addf %105, %106 : vector<8x32xf32>
    %c1 = arith.constant 1 : index
    %c0_58 = arith.constant 0 : index
    %c0_59 = arith.constant 0 : index
    %108 = vector.load %arg3[%c1, %c0_58, %c0_59] : memref<2x32x96xf32, #tpu.memory_space<vmem>>, vector<1x32x96xf32>
    %109 = vector.shape_cast %108 : vector<1x32x96xf32> to vector<32x96xf32>
    %cst_60 = arith.constant dense<0.000000e+00> : vector<8x96xf32>
    %110 = tpu.matmul %107, %109, %cst_60 {dimension_numbers = #tpu.dot_dimension_numbers<[1], [0], [0], [1], [0, 0, 1, 1], [], []>} : vector<8x32xf32>, vector<32x96xf32>, vector<8x96xf32> -> vector<8x96xf32>
    %c1_61 = arith.constant 1 : index
    %c0_62 = arith.constant 0 : index
    %c0_63 = arith.constant 0 : index
    %111 = vector.load %arg4[%c1_61, %c0_62, %c0_63] : memref<2x1x96xf32, #tpu.memory_space<vmem>>, vector<1x1x96xf32>
    %112 = vector.shape_cast %111 : vector<1x1x96xf32> to vector<1x96xf32>
    %113 = vector.broadcast %112 : vector<1x96xf32> to vector<8x96xf32>
    %114 = arith.addf %110, %113 : vector<8x96xf32>
    %115 = vector.extract_strided_slice %114 {offsets = [0, 0], sizes = [8, 32], strides = [1, 1]} : vector<8x96xf32> to vector<8x32xf32>
    %116 = vector.shape_cast %115 : vector<8x32xf32> to vector<8x4x8xf32>
    %117 = vector.extract_strided_slice %114 {offsets = [0, 32], sizes = [8, 32], strides = [1, 1]} : vector<8x96xf32> to vector<8x32xf32>
    %118 = vector.shape_cast %117 : vector<8x32xf32> to vector<8x4x8xf32>
    %119 = vector.extract_strided_slice %114 {offsets = [0, 64], sizes = [8, 32], strides = [1, 1]} : vector<8x96xf32> to vector<8x32xf32>
    %120 = vector.shape_cast %119 : vector<8x32xf32> to vector<8x4x8xf32>
    "tpu.trace_start"() <{level = 10 : i32, message = "qhd,khd->hqk"}> : () -> ()
    %cst_64 = arith.constant dense<0.000000e+00> : vector<4x8x8xf32>
    %121 = tpu.matmul %116, %118, %cst_64 {dimension_numbers = #tpu.dot_dimension_numbers<[2], [2], [0], [0], [0, 1, 0, 0, 1, 0], [1], [1]>} : vector<8x4x8xf32>, vector<8x4x8xf32>, vector<4x8x8xf32> -> vector<4x8x8xf32>
    "tpu.trace_stop"() : () -> ()
    %cst_65 = arith.constant dense<0xFF800000> : vector<4x8xf32>
    %122 = vector.multi_reduction <maximumf>, %121, %cst_65 [2] : vector<4x8x8xf32> to vector<4x8xf32>
    %123 = vector.shape_cast %122 : vector<4x8xf32> to vector<4x8x1xf32>
    %124 = vector.broadcast %123 : vector<4x8x1xf32> to vector<4x8x8xf32>
    %125 = arith.subf %121, %124 : vector<4x8x8xf32>
    %126 = math.exp %125 : vector<4x8x8xf32>
    %cst_66 = arith.constant dense<0.000000e+00> : vector<4x8xf32>
    %127 = vector.multi_reduction <add>, %126, %cst_66 [2] : vector<4x8x8xf32> to vector<4x8xf32>
    %128 = vector.shape_cast %127 : vector<4x8xf32> to vector<4x8x1xf32>
    %129 = tpu.reciprocal %128 {approx = true} : vector<4x8x1xf32> -> vector<4x8x1xf32>
    %130 = vector.broadcast %129 : vector<4x8x1xf32> to vector<4x8x8xf32>
    %131 = arith.mulf %126, %130 : vector<4x8x8xf32>
    "tpu.trace_start"() <{level = 10 : i32, message = "hqk,khd->qhd"}> : () -> ()
    %cst_67 = arith.constant dense<0.000000e+00> : vector<4x8x8xf32>
    %132 = tpu.matmul %120, %131, %cst_67 {dimension_numbers = #tpu.dot_dimension_numbers<[0], [2], [2], [1], [0, 1, 0, 2, 1, 1], [1], [0]>} : vector<8x4x8xf32>, vector<4x8x8xf32>, vector<4x8x8xf32> -> vector<4x8x8xf32>
    %133 = tpu.transpose %132, [2, 0, 1] : vector<4x8x8xf32> -> vector<8x4x8xf32>
    "tpu.trace_stop"() : () -> ()
    %134 = vector.shape_cast %133 : vector<8x4x8xf32> to vector<8x32xf32>
    %c1_68 = arith.constant 1 : index
    %c0_69 = arith.constant 0 : index
    %c0_70 = arith.constant 0 : index
    %135 = vector.load %arg5[%c1_68, %c0_69, %c0_70] : memref<2x32x32xf32, #tpu.memory_space<vmem>>, vector<1x32x32xf32>
    %136 = vector.shape_cast %135 : vector<1x32x32xf32> to vector<32x32xf32>
    %cst_71 = arith.constant dense<0.000000e+00> : vector<8x32xf32>
    %137 = tpu.matmul %134, %136, %cst_71 {dimension_numbers = #tpu.dot_dimension_numbers<[1], [0], [0], [1], [0, 0, 1, 1], [], []>} : vector<8x32xf32>, vector<32x32xf32>, vector<8x32xf32> -> vector<8x32xf32>
    %c1_72 = arith.constant 1 : index
    %c0_73 = arith.constant 0 : index
    %c0_74 = arith.constant 0 : index
    %138 = vector.load %arg6[%c1_72, %c0_73, %c0_74] : memref<2x1x32xf32, #tpu.memory_space<vmem>>, vector<1x1x32xf32>
    %139 = vector.shape_cast %138 : vector<1x1x32xf32> to vector<1x32xf32>
    %140 = vector.broadcast %139 : vector<1x32xf32> to vector<8x32xf32>
    %141 = arith.addf %137, %140 : vector<8x32xf32>
    %142 = arith.addf %107, %141 : vector<8x32xf32>
    %c1_75 = arith.constant 1 : index
    %c0_76 = arith.constant 0 : index
    %c0_77 = arith.constant 0 : index
    %143 = vector.load %arg7[%c1_75, %c0_76, %c0_77] : memref<2x1x32xf32, #tpu.memory_space<vmem>>, vector<1x1x32xf32>
    %144 = vector.shape_cast %143 : vector<1x1x32xf32> to vector<1x32xf32>
    %c1_78 = arith.constant 1 : index
    %c0_79 = arith.constant 0 : index
    %c0_80 = arith.constant 0 : index
    %145 = vector.load %arg8[%c1_78, %c0_79, %c0_80] : memref<2x1x32xf32, #tpu.memory_space<vmem>>, vector<1x1x32xf32>
    %146 = vector.shape_cast %145 : vector<1x1x32xf32> to vector<1x32xf32>
    %cst_81 = arith.constant dense<0.000000e+00> : vector<8xf32>
    %147 = vector.multi_reduction <add>, %142, %cst_81 [1] : vector<8x32xf32> to vector<8xf32>
    %148 = vector.shape_cast %147 : vector<8xf32> to vector<8x1xf32>
    %cst_82 = arith.constant 3.200000e+01 : f32
    %149 = vector.broadcast %cst_82 : f32 to vector<8x1xf32>
    %150 = arith.divf %148, %149 : vector<8x1xf32>
    %151 = arith.mulf %142, %142 : vector<8x32xf32>
    %cst_83 = arith.constant dense<0.000000e+00> : vector<8xf32>
    %152 = vector.multi_reduction <add>, %151, %cst_83 [1] : vector<8x32xf32> to vector<8xf32>
    %153 = vector.shape_cast %152 : vector<8xf32> to vector<8x1xf32>
    %cst_84 = arith.constant 3.200000e+01 : f32
    %154 = vector.broadcast %cst_84 : f32 to vector<8x1xf32>
    %155 = arith.divf %153, %154 : vector<8x1xf32>
    %156 = arith.mulf %150, %150 : vector<8x1xf32>
    %157 = arith.subf %155, %156 : vector<8x1xf32>
    %158 = vector.broadcast %150 : vector<8x1xf32> to vector<8x32xf32>
    %159 = arith.subf %142, %158 : vector<8x32xf32>
    %cst_85 = arith.constant 9.99999974E-6 : f32
    %160 = vector.broadcast %cst_85 : f32 to vector<8x1xf32>
    %161 = arith.addf %157, %160 : vector<8x1xf32>
    %162 = math.rsqrt %161 : vector<8x1xf32>
    %163 = vector.broadcast %162 : vector<8x1xf32> to vector<8x32xf32>
    %164 = arith.mulf %159, %163 : vector<8x32xf32>
    %165 = vector.broadcast %144 : vector<1x32xf32> to vector<8x32xf32>
    %166 = arith.mulf %164, %165 : vector<8x32xf32>
    %167 = vector.broadcast %146 : vector<1x32xf32> to vector<8x32xf32>
    %168 = arith.addf %166, %167 : vector<8x32xf32>
    %c1_86 = arith.constant 1 : index
    %c0_87 = arith.constant 0 : index
    %c0_88 = arith.constant 0 : index
    %169 = vector.load %arg9[%c1_86, %c0_87, %c0_88] : memref<2x32x128xf32, #tpu.memory_space<vmem>>, vector<1x32x128xf32>
    %170 = vector.shape_cast %169 : vector<1x32x128xf32> to vector<32x128xf32>
    %cst_89 = arith.constant dense<0.000000e+00> : vector<8x128xf32>
    %171 = tpu.matmul %168, %170, %cst_89 {dimension_numbers = #tpu.dot_dimension_numbers<[1], [0], [0], [1], [0, 0, 1, 1], [], []>} : vector<8x32xf32>, vector<32x128xf32>, vector<8x128xf32> -> vector<8x128xf32>
    %c1_90 = arith.constant 1 : index
    %c0_91 = arith.constant 0 : index
    %c0_92 = arith.constant 0 : index
    %172 = vector.load %arg10[%c1_90, %c0_91, %c0_92] : memref<2x1x128xf32, #tpu.memory_space<vmem>>, vector<1x1x128xf32>
    %173 = vector.shape_cast %172 : vector<1x1x128xf32> to vector<1x128xf32>
    %174 = vector.broadcast %173 : vector<1x128xf32> to vector<8x128xf32>
    %175 = arith.addf %171, %174 : vector<8x128xf32>
    %cst_93 = arith.constant 0.000000e+00 : f32
    %176 = vector.broadcast %cst_93 : f32 to vector<8x128xf32>
    %177 = arith.maximumf %175, %176 : vector<8x128xf32>
    %c1_94 = arith.constant 1 : index
    %c0_95 = arith.constant 0 : index
    %c0_96 = arith.constant 0 : index
    %178 = vector.load %arg11[%c1_94, %c0_95, %c0_96] : memref<2x128x32xf32, #tpu.memory_space<vmem>>, vector<1x128x32xf32>
    %179 = vector.shape_cast %178 : vector<1x128x32xf32> to vector<128x32xf32>
    %cst_97 = arith.constant dense<0.000000e+00> : vector<8x32xf32>
    %180 = tpu.matmul %177, %179, %cst_97 {dimension_numbers = #tpu.dot_dimension_numbers<[1], [0], [0], [1], [0, 0, 1, 1], [], []>} : vector<8x128xf32>, vector<128x32xf32>, vector<8x32xf32> -> vector<8x32xf32>
    %c1_98 = arith.constant 1 : index
    %c0_99 = arith.constant 0 : index
    %c0_100 = arith.constant 0 : index
    %181 = vector.load %arg12[%c1_98, %c0_99, %c0_100] : memref<2x1x32xf32, #tpu.memory_space<vmem>>, vector<1x1x32xf32>
    %182 = vector.shape_cast %181 : vector<1x1x32xf32> to vector<1x32xf32>
    %183 = vector.broadcast %182 : vector<1x32xf32> to vector<8x32xf32>
    %184 = arith.addf %180, %183 : vector<8x32xf32>
    %185 = arith.addf %168, %184 : vector<8x32xf32>
    %c1_101 = arith.constant 1 : index
    %c0_102 = arith.constant 0 : index
    %c0_103 = arith.constant 0 : index
    %186 = vector.load %arg13[%c1_101, %c0_102, %c0_103] : memref<2x1x32xf32, #tpu.memory_space<vmem>>, vector<1x1x32xf32>
    %187 = vector.shape_cast %186 : vector<1x1x32xf32> to vector<1x32xf32>
    %c1_104 = arith.constant 1 : index
    %c0_105 = arith.constant 0 : index
    %c0_106 = arith.constant 0 : index
    %188 = vector.load %arg14[%c1_104, %c0_105, %c0_106] : memref<2x1x32xf32, #tpu.memory_space<vmem>>, vector<1x1x32xf32>
    %189 = vector.shape_cast %188 : vector<1x1x32xf32> to vector<1x32xf32>
    %cst_107 = arith.constant dense<0.000000e+00> : vector<8xf32>
    %190 = vector.multi_reduction <add>, %185, %cst_107 [1] : vector<8x32xf32> to vector<8xf32>
    %191 = vector.shape_cast %190 : vector<8xf32> to vector<8x1xf32>
    %cst_108 = arith.constant 3.200000e+01 : f32
    %192 = vector.broadcast %cst_108 : f32 to vector<8x1xf32>
    %193 = arith.divf %191, %192 : vector<8x1xf32>
    %194 = arith.mulf %185, %185 : vector<8x32xf32>
    %cst_109 = arith.constant dense<0.000000e+00> : vector<8xf32>
    %195 = vector.multi_reduction <add>, %194, %cst_109 [1] : vector<8x32xf32> to vector<8xf32>
    %196 = vector.shape_cast %195 : vector<8xf32> to vector<8x1xf32>
    %cst_110 = arith.constant 3.200000e+01 : f32
    %197 = vector.broadcast %cst_110 : f32 to vector<8x1xf32>
    %198 = arith.divf %196, %197 : vector<8x1xf32>
    %199 = arith.mulf %193, %193 : vector<8x1xf32>
    %200 = arith.subf %198, %199 : vector<8x1xf32>
    %201 = vector.broadcast %193 : vector<8x1xf32> to vector<8x32xf32>
    %202 = arith.subf %185, %201 : vector<8x32xf32>
    %cst_111 = arith.constant 9.99999974E-6 : f32
    %203 = vector.broadcast %cst_111 : f32 to vector<8x1xf32>
    %204 = arith.addf %200, %203 : vector<8x1xf32>
    %205 = math.rsqrt %204 : vector<8x1xf32>
    %206 = vector.broadcast %205 : vector<8x1xf32> to vector<8x32xf32>
    %207 = arith.mulf %202, %206 : vector<8x32xf32>
    %208 = vector.broadcast %187 : vector<1x32xf32> to vector<8x32xf32>
    %209 = arith.mulf %207, %208 : vector<8x32xf32>
    %210 = vector.broadcast %189 : vector<1x32xf32> to vector<8x32xf32>
    %211 = arith.addf %209, %210 : vector<8x32xf32>
    %c0_112 = arith.constant 0 : index
    %c0_113 = arith.constant 0 : index
    %c0_114 = arith.constant 0 : index
    %212 = vector.load %arg15[%c0_112, %c0_113, %c0_114] : memref<1x8x32xf32, #tpu.memory_space<vmem>>, vector<1x8x32xf32>
    %213 = vector.shape_cast %212 : vector<1x8x32xf32> to vector<8x32xf32>
    %214 = vector.shape_cast %211 : vector<8x32xf32> to vector<1x8x32xf32>
    tpu.vector_store %arg15[%c0_112, %c0_113, %c0_114], %214 {strides = array<i32>} : memref<1x8x32xf32, #tpu.memory_space<vmem>>, vector<1x8x32xf32>,
    return
  }
  func.func @transform_0(%arg0: i32) -> (i32, i32, i32) {
    %c0_i32 = arith.constant 0 : i32
    %c0_i32_0 = arith.constant 0 : i32
    %c0_i32_1 = arith.constant 0 : i32
    return %arg0, %c0_i32, %c0_i32_0 : i32, i32, i32
  }
  func.func @transform_1(%arg0: i32) -> (i32, i32) {
    %c0_i32 = arith.constant 0 : i32
    %c0_i32_0 = arith.constant 0 : i32
    %c0_i32_1 = arith.constant 0 : i32
    return %c0_i32, %c0_i32_0 : i32, i32
  }
  func.func @transform_2(%arg0: i32) -> (i32, i32, i32) {
    %c0_i32 = arith.constant 0 : i32
    %c0_i32_0 = arith.constant 0 : i32
    %c0_i32_1 = arith.constant 0 : i32
    %c0_i32_2 = arith.constant 0 : i32
    return %c0_i32, %c0_i32_0, %c0_i32_1 : i32, i32, i32
  }
  func.func @transform_3(%arg0: i32) -> (i32, i32, i32) {
    %c0_i32 = arith.constant 0 : i32
    %c0_i32_0 = arith.constant 0 : i32
    %c0_i32_1 = arith.constant 0 : i32
    %c0_i32_2 = arith.constant 0 : i32
    return %c0_i32, %c0_i32_0, %c0_i32_1 : i32, i32, i32
  }
  func.func @transform_4(%arg0: i32) -> (i32, i32, i32) {
    %c0_i32 = arith.constant 0 : i32
    %c0_i32_0 = arith.constant 0 : i32
    %c0_i32_1 = arith.constant 0 : i32
    %c0_i32_2 = arith.constant 0 : i32
    return %c0_i32, %c0_i32_0, %c0_i32_1 : i32, i32, i32
  }
  func.func @transform_5(%arg0: i32) -> (i32, i32, i32) {
    %c0_i32 = arith.constant 0 : i32
    %c0_i32_0 = arith.constant 0 : i32
    %c0_i32_1 = arith.constant 0 : i32
    %c0_i32_2 = arith.constant 0 : i32
    return %c0_i32, %c0_i32_0, %c0_i32_1 : i32, i32, i32
  }
  func.func @transform_6(%arg0: i32) -> (i32, i32, i32) {
    %c0_i32 = arith.constant 0 : i32
    %c0_i32_0 = arith.constant 0 : i32
    %c0_i32_1 = arith.constant 0 : i32
    %c0_i32_2 = arith.constant 0 : i32
    return %c0_i32, %c0_i32_0, %c0_i32_1 : i32, i32, i32
  }
  func.func @transform_7(%arg0: i32) -> (i32, i32, i32) {
    %c0_i32 = arith.constant 0 : i32
    %c0_i32_0 = arith.constant 0 : i32
    %c0_i32_1 = arith.constant 0 : i32
    %c0_i32_2 = arith.constant 0 : i32
    return %c0_i32, %c0_i32_0, %c0_i32_1 : i32, i32, i32
  }
  func.func @transform_8(%arg0: i32) -> (i32, i32, i32) {
    %c0_i32 = arith.constant 0 : i32
    %c0_i32_0 = arith.constant 0 : i32
    %c0_i32_1 = arith.constant 0 : i32
    %c0_i32_2 = arith.constant 0 : i32
    return %c0_i32, %c0_i32_0, %c0_i32_1 : i32, i32, i32
  }
  func.func @transform_9(%arg0: i32) -> (i32, i32, i32) {
    %c0_i32 = arith.constant 0 : i32
    %c0_i32_0 = arith.constant 0 : i32
    %c0_i32_1 = arith.constant 0 : i32
    %c0_i32_2 = arith.constant 0 : i32
    return %c0_i32, %c0_i32_0, %c0_i32_1 : i32, i32, i32
  }
  func.func @transform_10(%arg0: i32) -> (i32, i32, i32) {
    %c0_i32 = arith.constant 0 : i32
    %c0_i32_0 = arith.constant 0 : i32
    %c0_i32_1 = arith.constant 0 : i32
    %c0_i32_2 = arith.constant 0 : i32
    return %c0_i32, %c0_i32_0, %c0_i32_1 : i32, i32, i32
  }
  func.func @transform_11(%arg0: i32) -> (i32, i32, i32) {
    %c0_i32 = arith.constant 0 : i32
    %c0_i32_0 = arith.constant 0 : i32
    %c0_i32_1 = arith.constant 0 : i32
    %c0_i32_2 = arith.constant 0 : i32
    return %c0_i32, %c0_i32_0, %c0_i32_1 : i32, i32, i32
  }
  func.func @transform_12(%arg0: i32) -> (i32, i32, i32) {
    %c0_i32 = arith.constant 0 : i32
    %c0_i32_0 = arith.constant 0 : i32
    %c0_i32_1 = arith.constant 0 : i32
    %c0_i32_2 = arith.constant 0 : i32
    return %c0_i32, %c0_i32_0, %c0_i32_1 : i32, i32, i32
  }
  func.func @transform_13(%arg0: i32) -> (i32, i32, i32) {
    %c0_i32 = arith.constant 0 : i32
    %c0_i32_0 = arith.constant 0 : i32
    %c0_i32_1 = arith.constant 0 : i32
    %c0_i32_2 = arith.constant 0 : i32
    return %c0_i32, %c0_i32_0, %c0_i32_1 : i32, i32, i32
  }
  func.func @transform_14(%arg0: i32) -> (i32, i32, i32) {
    %c0_i32 = arith.constant 0 : i32
    %c0_i32_0 = arith.constant 0 : i32
    %c0_i32_1 = arith.constant 0 : i32
    return %arg0, %c0_i32, %c0_i32_0 : i32, i32, i32
  }
}

</mosaic_0001>

<bundles_post_ra>
// kernel: tpu_custom_call.1
= control target key start
LH: loop header
LB: loop body
LE: loop exit
PB: predicated region body
PF: predicated region fallthrough
CT: control target
= control target key end

     0   :  { %s5068_s0 = inlined_call_operand.vmem [shape: f32[2,8,32], index: 0, kind: input, shape index: {}]   ;;  %s5069_s1 = inlined_call_operand.vmem [shape: f32[8,32], index: 1, kind: input, shape index: {}]   ;;  %s5070_s2 = inlined_call_operand.vmem [shape: f32[2,32,96], index: 2, kind: input, shape index: {}]   ;;  %s5071_s3 = inlined_call_operand.vmem [shape: f32[2,1,96], index: 3, kind: input, shape index: {}]   ;;  %s5072_s4 = inlined_call_operand.vmem [shape: f32[2,32,32], index: 4, kind: input, shape index: {}]   ;;  %s5073_s5 = inlined_call_operand.vmem [shape: f32[2,1,32], index: 5, kind: input, shape index: {}]   ;;  %s5074_s6 = inlined_call_operand.vmem [shape: f32[2,1,32], index: 6, kind: input, shape index: {}]   ;;  %s5075_s7 = inlined_call_operand.vmem [shape: f32[2,1,32], index: 7, kind: input, shape index: {}]   ;;  %s5076_s8 = inlined_call_operand.vmem [shape: f32[2,32,128], index: 8, kind: input, shape index: {}]   ;;  %s5077_s9 = inlined_call_operand.vmem [shape: f32[2,1,128], index: 9, kind: input, shape index: {}]   ;;  %s5078_s10 = inlined_call_operand.vmem [shape: f32[2,128,32], index: 10, kind: input, shape index: {}]   ;;  %s5079_s11 = inlined_call_operand.vmem [shape: f32[2,1,32], index: 11, kind: input, shape index: {}]   ;;  %s5080_s12 = inlined_call_operand.vmem [shape: f32[2,1,32], index: 12, kind: input, shape index: {}]   ;;  %s5081_s13 = inlined_call_operand.vmem [shape: f32[2,1,32], index: 13, kind: input, shape index: {}]   ;;  %s5082_s14 = inlined_call_operand.hbm [shape: f32[2,8,32], index: 14, kind: output, shape index: {}]  }
   0x1   :  { %5093 = sst [smem:[#allocation6_spill]] %s5068_s0 }
   0x2   :  { %5094 = sst [smem:[#allocation7_spill]] %s5069_s1 }
   0x3   :  { %5095 = sst [smem:[#allocation8_spill]] %s5070_s2 }
   0x4   :  { %5096 = sst [smem:[#allocation9_spill]] %s5071_s3 }
   0x5   :  { %19 = vsyncpa [#allocation3], 0 }
   0x6   :  { %21 = vsyncpa [#allocation3 + $0x1], 0  ;;  %s4518_s29 = smov 0   ;;  %s4520_s30 = smov 0  }
   0x7   :  { %s4522_s15 = smov 0   ;;  %s4524_s16 = smov 0  }
   0x8 LB: > { %s4539_s17 = sadd.s32 4294967295, %s4427_s16   ;;  %s3781_s18 = sadd.s32 4294967294, %s4427_s16   ;;  %s4427_s16 = sphi %s4524_s16, %s5116_s16   ;;  %s4423_s15 = sphi %s4522_s15, %s5115_s15   ;;  %s4419_s30 = sphi %s4520_s30, %s5114_s30   ;;  %s4415_s29 = sphi %s4518_s29, %s5113_s29  }
   0x9   : > { %s4543_s19 = sadd.s32 1, %s4427_s16   ;;  %s333_s20 = sadd.s32 1, %s4423_s15 }
   0xa   : > { %s330_s21 = ssub.s32 %s4427_s16, %s4543_s19  ;;  %p343_p0 = scmp.ne.s32.totalorder %s4423_s15, %s4419_s30 }
   0xb   : > { %p331_p1 = scmp.eq.s32.totalorder %s330_s21, 0  ;;  %p344_p2 = scmp.eq.s32.totalorder %s4539_s17, 1 }
   0xc   : > { %p349_p3 = scmp.ne.s32.totalorder %s4419_s30, %s4415_s29  ;;  %p350_p4 = scmp.eq.s32.totalorder %s3781_s18, 1 }
   0xd   : > { %s4554_s22 = scalar_select %p331_p1, %s4423_s15, %s333_s20  }
   0xe   : > { %p4556_p5 = por %p344_p2, %p343_p0  ;;  %p4560_p6 = por %p350_p4, %p349_p3 }
   0xf   : > { %5097 = sst [smem:[#allocation5_spill]] %s4554_s22  ;;  %p3784_p7 = scmp.ge.s32.totalorder %s4427_s16, 1 }
  0x10   : > { %p414_p8 = scmp.lt.s32.totalorder %s4427_s16, 3 }
  0x12   : > { %p415_p9 = pnand %p3784_p7, %p414_p8 }
  0x13   : > { %s5100_s2 = sld [smem:[#allocation8_spill]] (!%p415_p9)  ;;  %v4429_v3 = vmov (!%p415_p9), 0.0|0.0   ;;  %vm4430_vm0 = vmmov (!%p415_p9), 0   ;;  %v4431_v6 = vmov (!%p415_p9), 0.0   ;;  %p459_p10 = scmp.lt.s32.totalorder (!%p415_p9), %s4539_s17, 1  ;;  %vm477_vm1 = vcmask (!%p415_p9), 261120  }
  0x14   : > { %418 = sbr.rel (%p415_p9) target bundleno = 5249 (0x1481), region = 76  ;;  %4189 = vmatprep.subr.bf16.mxu0 (!%p415_p9), %v4429_v3  ;;  %3981 = vmatprep.mubr.msk.f32.mxu0 (!%p415_p9), %vm4430_vm0, %v4431_v6  ;;  %s5101_s1 = sld [smem:[#allocation7_spill]] (!%p415_p9)  ;;  %vm698_vm2 = vcmask (!%p415_p9), 64512   ;;  %vm1752_vm3 = vcmask (!%p415_p9), 130048   ;;  %vm1754_vm4 = vcmask (!%p415_p9), 195584  }
  0x15   : > { %3984 = vmatprep.subr.mxu1 (!%p415_p9), %v4431_v6  ;;  %3986 = vmatprep.mubr.msk.f32.mxu1 (!%p415_p9), %vm4430_vm0, %v4431_v6  ;;  %s5102_s0 = sld [smem:[#allocation6_spill]] (!%p415_p9)  ;;  %s5103_s3 = sld [smem:[#allocation9_spill]] (!%p415_p9) }
  0x16   : > { %s5091_s27 = smov (!%p415_p9), 120   ;;  %s5088_s22 = smov (!%p415_p9), 96  }
  0x17   : > { %s5092_s28 = smov (!%p415_p9), 112   ;;  %s5083_s18 = smov (!%p415_p9), 64  }
  0x18   : > { %s5086_s21 = smov (!%p415_p9), 24  }
  0x19   : > { %v466_v0 = vld [vmem:[%s5100_s2] sm:$0xff] (!%p415_p9)  ;;  %v467_v1 = vld [vmem:[%s5100_s2 + $0x8] sm:$0xff] (!%p415_p9)  ;;  %v468_v2 = vld [vmem:[%s5100_s2 + $0x10] sm:$0xff] (!%p415_p9) }
  0x1a   : > { %v4190_v4 = vpack.c.bf16 (!%p415_p9), %v467_v1, %v466_v0  ;;  %v469_v5 = vld [vmem:[%s5100_s2 + $0x18] sm:$0xff] (!%p415_p9)  ;;  %v464_v8 = vld [vmem:[%s5101_s1] sm:$0xff] (!%p415_p9) }
  0x1b   : > { %v4193_v7 = vpack.c.bf16 %v469_v5, %v468_v2  ;;  %s460_s25 = scalar_select %p459_p10, %s4539_s17, 1  ;;  %v3787_v11 = vld [vmem:[%s5103_s3] ss:$0 sm:$0xff] }
  0x1c   : > { %4191 = vmatpush3.bf16.msra.mxu0 %v4190_v4 }
  0x1d   : > { %4192 = vmatprep.subr.bf16.mxu0 %v4429_v3  ;;  %s3786_s26 = sshll.u32 %s460_s25, 3  ;;  %s5107_s25 = smov 96  }
  0x1e   : > { %s462_s20 = scalar_lea.vmem %s5102_s0, %s3786_s26  ;;  %s5090_s26 = smov 104  }
  0x1f   : > { %v463_v9 = vld [vmem:[%s462_s20] sm:$0xff]  ;;  %s5085_s20 = smov 8  }
  0x20   : > { %4194 = vmatpush3.bf16.msra.mxu0 %v4193_v7  ;;  %v4593_v10 = vadd.f32 %v464_v8, %v463_v9 }
  0x21   : > { %3999 = vmatprep.subr.mxu0 %v4431_v6 }
  0x23   : > { %3982 = vmatmul.mubr.msk.f32.vlgmr.msra.gmra.mrb[0].mxu0 %vm477_vm1, %v4593_v10 }
  0x24   : > { %4001 = vmatprep.mubr.msk.f32.mxu0 %vm4430_vm0, %v4431_v6 }
  0xf6   : > { %v547_v12 = vpop.f32.mrb[0].mxu0 }
  0xf7   : > { %v548_v13 = vadd.f32 %v3787_v11, %v547_v12  ;;  %v3983_v14 = vpop.f32.mrb[1].mxu0 }
  0xf9   : > { %556 = vrot.lane.b32.xlu1 %v548_v13, %s5090_s26  ;;  %552 = vrot.lane.b32.xlu0 %v548_v13, %s5091_s27  ;;  %s5108_s26 = smov 64   ;;  %s5111_s27 = smov 24  }
  0xfd   : > { %558 = vrot.lane.b32.xlu1 %v548_v13, %s5088_s22  ;;  %554 = vrot.lane.b32.xlu0 %v548_v13, %s5092_s28  ;;  %s456_s28 = sand.u32 1, %s4419_s30  }
  0xfe   : > { %s3709_s1 = scalar_lea.sflag [#allocation3], %s456_s28 }
 0x16b   : > { %v553_v15 = vpop.permute.xlu0 %552  ;;  %v557_v16 = vpop.permute.xlu1 %556 }
 0x16c   : > { %560 = vrot.lane.b32.xlu0 %v553_v15, %s5088_s22 }
 0x16f   : > { %v555_v17 = vpop.permute.xlu0 %554  ;;  %v559_v18 = vpop.permute.xlu1 %558 }
 0x170   : > { %564 = vrot.lane.b32.xlu0 %v557_v16, %s5088_s22  ;;  %562 = vrot.lane.b32.xlu1 %v555_v17, %s5088_s22  ;;  %s5110_s22 = smov 8  }
 0x199   : > { %570 = vxpose.xlu1.b32.start.end [1/1] (short) (narrow) %v559_v18, 8 }
 0x1de   : > { %v561_v19 = vpop.permute.xlu0 %560 }
 0x1df   : > { %602 = vxpose.xlu0.b32.start.end [1/1] (short) (narrow) %v561_v19, 8 }
 0x1e2   : > { %v563_v20 = vpop.permute.xlu1 %562  ;;  %v565_v21 = vpop.permute.xlu0 %564 }
 0x1e3   : > { %634 = vxpose.xlu0.b32.start.end [1/1] (short) (narrow) %v563_v20, 8 }
 0x1e7   : > { %666 = vxpose.xlu0.b32.start.end [1/1] (short) (narrow) %v565_v21, 8 }
 0x219   : > { %v586_v22 = vpop.trf.xlu1 }
 0x21a   : > { %3985 = vmatpush3.msra.mxu1 %v586_v22 }
 0x21b   : > { %3987 = vmatmul.mubr.msk.f32.vlgmr.msra.gmra.mrb[0].mxu1 %vm698_vm2, %v548_v13  ;;  %3989 = vmatprep.subr.mxu1 %v4431_v6 }
 0x21c   : > { %3991 = vmatprep.mubr.msk.f32.mxu1 %vm4430_vm0, %v4431_v6 }
 0x25f   : > { %v618_v23 = vpop.trf.xlu0 }
 0x260   : > { %3990 = vmatpush3.msra.mxu1 %v618_v23 }
 0x261   : > { %3992 = vmatmul.mubr.msk.f32.vlgmr.msra.gmra.mrb[2].mxu1 %vm698_vm2, %v553_v15  ;;  %3994 = vmatprep.subr.mxu1 %v4431_v6 }
 0x262   : > { %3996 = vmatprep.mubr.msk.f32.mxu1 %vm4430_vm0, %v4431_v6 }
 0x263   : > { %v650_v24 = vpop.trf.xlu0 }
 0x264   : > { %3995 = vmatpush3.msra.mxu1 %v650_v24 }
 0x265   : > { %3997 = vmatmul.mubr.msk.f32.vlgmr.msra.gmra.mrb[4].mxu1 %vm698_vm2, %v555_v17  ;;  %4004 = vmatprep.subr.mxu1 %v4431_v6 }
 0x266   : > { %4006 = vmatprep.mubr.msk.f32.mxu1 %vm4430_vm0, %v4431_v6 }
 0x267   : > { %v682_v25 = vpop.trf.xlu0 }
 0x268   : > { %4000 = vmatpush3.msra.mxu0 %v682_v25  ;;  %v1756_v25 = vld [vmem:[%s5072_s4] sm:$0xff] }
 0x269   : > { %4002 = vmatmul.mubr.msk.f32.vlgmr.msra.gmra.mrb[2].mxu0 %vm698_vm2, %v557_v16  ;;  %4009 = vmatprep.subr.mxu0 %v4431_v6 }
 0x26a   : > { %4011 = vmatprep.mubr.msk.f32.mxu0 %vm4430_vm0, %v4431_v6 }
 0x2ee   : > { %v767_v26 = vpop.f32.mrb[0].mxu1 }
 0x2ef   : > { %v3988_v27 = vpop.f32.mrb[1].mxu1  ;;  %v987_v28 = vsel %vm698_vm2, %v767_v26, -inf }
 0x2f0   : > { %988 = vmax.xlane.f32.xlu1 %v987_v28 }
 0x334   : > { %v839_v29 = vpop.f32.mrb[2].mxu1 }
 0x335   : > { %v3993_v30 = vpop.f32.mrb[3].mxu1  ;;  %v990_v31 = vsel %vm698_vm2, %v839_v29, -inf }
 0x336   : > { %991 = vmax.xlane.f32.xlu0 %v990_v31  ;;  %v1608_v31 = vlaneseq }
 0x338   : > { %v911_v32 = vpop.f32.mrb[4].mxu1 }
 0x339   : > { %v3998_v33 = vpop.f32.mrb[5].mxu1  ;;  %v993_v34 = vsel %vm698_vm2, %v911_v32, -inf }
 0x33a   : > { %994 = vmax.xlane.f32.xlu1 %v993_v34 }
 0x33c   : > { %v983_v35 = vpop.f32.mrb[2].mxu0 }
 0x33d   : > { %v4003_v36 = vpop.f32.mrb[3].mxu0  ;;  %v996_v37 = vsel %vm698_vm2, %v983_v35, -inf }
 0x33e   : > { %997 = vmax.xlane.f32.xlu1 %v996_v37 }
 0x34c   : > { %1031 = vrot.lane.b32.xlu0 %v548_v13, %s5083_s18 }
 0x34f   : > { %1033 = vrot.lane.b32.xlu1 %v553_v15, %s5083_s18 }
 0x350   : > { %1037 = vrot.lane.b32.xlu0 %v557_v16, %s5083_s18 }
 0x353   : > { %1035 = vrot.lane.b32.xlu1 %v555_v17, %s5083_s18  ;;  %s5087_s18 = smov 16  }
 0x37d   : > { %v989_v38 = vpop.xlane.xlu1 %988 }
 0x37e   : > { %v999_v39 = vsub.f32 %v767_v26, %v989_v38  ;;  %v1757_v26 = vld [vmem:[%s5072_s4 + $0x8] sm:$0xff] }
 0x37f   : > { %v4196_v27 = vpack.c.bf16 %v1757_v26, %v1756_v25  ;;  %v3803_v26 = vld [vmem:[%s5073_s5] ss:$0 sm:$0xff] }
 0x380   : > { %v1003_v40 = vmul.f32 1.442695, %v999_v39 }
 0x382   : > { %4325 = vpow2.f32 %v1003_v40 }
 0x38c   : > { %v4326_v41 = vpop.eup %4325 }
 0x38d   : > { %v1011_v42 = vsel %vm698_vm2, %v4326_v41, 0.0 }
 0x38e   : > { %1012 = vadd.xlane.f32.xlu1 %v1011_v42 }
 0x3c3   : > { %v992_v43 = vpop.xlane.xlu0 %991 }
 0x3c4   : > { %v1000_v44 = vsub.f32 %v839_v29, %v992_v43  ;;  %v4437_v29 = vmov 1983009808  }
 0x3c5   : > { %v1606_v30 = vunpack.c.l.s4 %v4437_v29 }
 0x3c6   : > { %v1005_v45 = vmul.f32 1.442695, %v1000_v44 }
 0x3c7   : > { %v995_v46 = vpop.xlane.xlu1 %994  ;;  %v1032_v59 = vpop.permute.xlu0 %1031  ;;  %v1607_v34 = vunpack.c.0.s8 %v1606_v30 }
 0x3c8   : > { %4327 = vpow2.f32 %v1005_v45  ;;  %v1001_v47 = vsub.f32 %v911_v32, %v995_v46  ;;  %v4438_v32 = vmov 1934713408  }
 0x3c9   : > { %v1638_v33 = vunpack.c.l.s4 %v4438_v32 }
 0x3ca   : > { %v1007_v48 = vmul.f32 1.442695, %v1001_v47 }
 0x3cb   : > { %v998_v49 = vpop.xlane.xlu1 %997  ;;  %v1038_v61 = vpop.permute.xlu0 %1037  ;;  %v1639_v38 = vunpack.c.0.s8 %v1638_v33 }
 0x3cc   : > { %4329 = vpow2.f32 %v1007_v48  ;;  %v1002_v50 = vsub.f32 %v983_v35, %v998_v49  ;;  %v1609_v35 = vshrl.u32 %v1608_v31, 7 }
 0x3ce   : > { %v1009_v51 = vmul.f32 1.442695, %v1002_v50  ;;  %v4665_v39 = vsub.s32 %v1607_v34, %v1609_v35  ;;  %v4667_v45 = vsub.s32 %v1639_v38, %v1609_v35  ;;  %v1873_v34 = vld [vmem:[%s5076_s8] sm:$0xff]  ;;  %v1874_v35 = vld [vmem:[%s5076_s8 + $0x8] sm:$0xff] }
 0x3cf   : > { %v1034_v58 = vpop.permute.xlu1 %1033 }
 0x3d0   : > { %4331 = vpow2.f32 %v1009_v51 }
 0x3d2   : > { %v4328_v52 = vpop.eup %4327 }
 0x3d3   : > { %v1014_v53 = vsel %vm698_vm2, %v4328_v52, 0.0  ;;  %v1036_v60 = vpop.permute.xlu1 %1035 }
 0x3d4   : > { %1015 = vadd.xlane.f32.xlu0 %v1014_v53 }
 0x3d6   : > { %v4330_v54 = vpop.eup %4329 }
 0x3d7   : > { %v1017_v55 = vsel %vm698_vm2, %v4330_v54, 0.0 }
 0x3d8   : > { %1018 = vadd.xlane.f32.xlu0 %v1017_v55  ;;  %v1759_v55 = vld [vmem:[%s5072_s4 + $0x18] sm:$0xff] }
 0x3da   : > { %v4332_v56 = vpop.eup %4331 }
 0x3db   : > { %v1020_v57 = vsel %vm698_vm2, %v4332_v56, 0.0 }
 0x3dc   : > { %1021 = vadd.xlane.f32.xlu1 %v1020_v57 }
 0x405   : > { %1043 = vxpose.xlu0.b32.start.end [1/1] (short) (narrow) %v1032_v59, 8 }
 0x409   : > { %1107 = vxpose.xlu0.b32.start.end [1/1] (short) (narrow) %v1036_v60, 8 }
 0x40d   : > { %1139 = vxpose.xlu0.b32.start.end [1/1] (short) (narrow) %v1038_v61, 8 }
 0x40f   : > { %1075 = vxpose.xlu1.b32.start.end [1/1] (short) (narrow) %v1034_v58, 8 }
 0x41b   : > { %v1013_v62 = vpop.xlane.xlu1 %1012 }
 0x41c   : > { %4333 = vrcp.f32 %v1013_v62 }
 0x426   : > { %v4334_v63 = vpop.eup %4333 }
 0x427   : > { %v1027_v0 = vmul.f32 %v4334_v63, %v4326_v41 }
 0x429   : > { %4005 = vmatpush3.xpose.msk.msra.mxu1 %vm698_vm2, %v1027_v0 }
 0x42a   : > { %4014 = vmatprep.subr.mxu1 %v4431_v6 }
 0x461   : > { %v1016_v1 = vpop.xlane.xlu0 %1015 }
 0x462   : > { %4335 = vrcp.f32 %v1016_v1 }
 0x465   : > { %v1019_v5 = vpop.xlane.xlu0 %1018 }
 0x466   : > { %4337 = vrcp.f32 %v1019_v5 }
 0x469   : > { %v1022_v7 = vpop.xlane.xlu1 %1021 }
 0x46a   : > { %4339 = vrcp.f32 %v1022_v7 }
 0x46c   : > { %v4336_v2 = vpop.eup %4335 }
 0x46d   : > { %v1028_v4 = vmul.f32 %v4336_v2, %v4328_v52 }
 0x46f   : > { %4010 = vmatpush3.xpose.msk.msra.mxu0 %vm698_vm2, %v1028_v4 }
 0x470   : > { %4019 = vmatprep.subr.mxu0 %v4431_v6  ;;  %v4338_v8 = vpop.eup %4337 }
 0x471   : > { %v1029_v9 = vmul.f32 %v4338_v8, %v4330_v54  ;;  %v1758_v54 = vld [vmem:[%s5072_s4 + $0x10] sm:$0xff] }
 0x472   : > { %v4199_v60 = vpack.c.bf16 %v1759_v55, %v1758_v54  ;;  %v1967_v54 = vld [vmem:[%s5078_s10 + $0x48] sm:$0xff] }
 0x474   : > { %v4340_v13 = vpop.eup %4339 }
 0x475   : > { %v1030_v14 = vmul.f32 %v4340_v13, %v4332_v56 }
 0x485   : > { %v1059_v11 = vpop.trf.xlu0 }
 0x486   : > { %4007 = vmatmul.mubr.msk.f32.vlgmr.msra.gmra.mrb[6].mxu1 %vm698_vm2, %v1059_v11 }
 0x487   : > { %4015 = vmatpush3.xpose.msk.msra.mxu1 %vm698_vm2, %v1029_v9  ;;  %4016 = vmatprep.mubr.msk.f32.mxu1 %vm4430_vm0, %v4431_v6 }
 0x488   : > { %4207 = vmatprep.subr.bf16.mxu1 %v4429_v3 }
 0x489   : > { %v1123_v12 = vpop.trf.xlu0 }
 0x48a   : > { %4017 = vmatmul.mubr.msk.f32.vlgmr.msra.gmra.mrb[8].mxu1 %vm698_vm2, %v1123_v12 }
 0x48b   : > { %4078 = vmatprep.mubr.msk.f32.mxu1 %vm4430_vm0, %v4431_v6 }
 0x48d   : > { %v1155_v16 = vpop.trf.xlu0 }
 0x48f   : > { %v1091_v15 = vpop.trf.xlu1 }
 0x490   : > { %4012 = vmatmul.mubr.msk.f32.vlgmr.msra.gmra.mrb[4].mxu0 %vm698_vm2, %v1091_v15 }
 0x491   : > { %4020 = vmatpush3.xpose.msk.msra.mxu0 %vm698_vm2, %v1030_v14  ;;  %4021 = vmatprep.mubr.msk.f32.mxu0 %vm4430_vm0, %v4431_v6 }
 0x492   : > { %4195 = vmatprep.subr.bf16.mxu0 %v4429_v3 }
 0x494   : > { %4022 = vmatmul.mubr.msk.f32.vlgmr.msra.gmra.mrb[6].mxu0 %vm698_vm2, %v1155_v16 }
 0x495   : > { %4032 = vmatprep.mubr.msk.f32.mxu0 %vm4430_vm0, %v4431_v6  ;;  %4197 = vmatpush3.bf16.msra.mxu0 %v4196_v27 }
 0x496   : > { %4198 = vmatprep.subr.bf16.mxu0 %v4429_v3 }
 0x499   : > { %4200 = vmatpush3.bf16.msra.mxu0 %v4199_v60  ;;  %v1971_v60 = vld [vmem:[%s5078_s10 + $0x68] sm:$0xff] }
 0x49a   : > { %4201 = vmatprep.subr.bf16.mxu0 %v4429_v3 }
 0x559   : > { %v1243_v17 = vpop.f32.mrb[6].mxu1 }
 0x55a   : > { %v4008_v18 = vpop.f32.mrb[7].mxu1  ;;  %1475 = vxpose.xlu1.b32.start.end [1/1] (short) (narrow) %v1243_v17, 8 }
 0x55d   : > { %v1395_v19 = vpop.f32.mrb[8].mxu1 }
 0x55e   : > { %v4018_v20 = vpop.f32.mrb[9].mxu1  ;;  %1539 = vxpose.xlu1.b32.start.end [1/1] (short) (narrow) %v1395_v19, 8 }
 0x563   : > { %v1319_v21 = vpop.f32.mrb[4].mxu0 }
 0x564   : > { %1507 = vxpose.xlu0.b32.start.end [1/1] (short) (narrow) %v1319_v21, 8  ;;  %v4013_v22 = vpop.f32.mrb[5].mxu0 }
 0x567   : > { %v1471_v23 = vpop.f32.mrb[6].mxu0 }
 0x568   : > { %1571 = vxpose.xlu0.b32.start.end [1/1] (short) (narrow) %v1471_v23, 8  ;;  %v4023_v24 = vpop.f32.mrb[7].mxu0 }
 0x5da   : > { %v1491_v28 = vpop.trf.xlu1 }
 0x5de   : > { %v1555_v36 = vpop.trf.xlu1 }
 0x5df   : > { %v1603_v40 = vcombine.low %v1491_v28, %v1555_v36  ;;  %v1604_v41 = vcombine.high %v1491_v28, %v1555_v36  ;;  %v1875_v36 = vld [vmem:[%s5076_s8 + $0x10] sm:$0xff] }
 0x5e1   : > { %v1611_v46 = vrot.slane %v1603_v40, %v4665_v39  ;;  %v1618_v47 = vrot.slane %v1604_v41, %v4665_v39  ;;  %v1958_v40 = vld [vmem:[%s5078_s10] sm:$0xff]  ;;  %v1959_v41 = vld [vmem:[%s5078_s10 + $0x8] sm:$0xff] }
 0x5e4   : > { %v1523_v37 = vpop.trf.xlu0 }
 0x5e8   : > { %v1587_v42 = vpop.trf.xlu0 }
 0x5e9   : > { %v1619_v43 = vcombine.low %v1523_v37, %v1587_v42  ;;  %v1620_v44 = vcombine.high %v1523_v37, %v1587_v42  ;;  %v1876_v37 = vld [vmem:[%s5076_s8 + $0x18] sm:$0xff]  ;;  %v1960_v42 = vld [vmem:[%s5078_s10 + $0x10] sm:$0xff] }
 0x5ea   : > { %v4205_v38 = vpack.c.bf16 %v1876_v37, %v1875_v36 }
 0x5eb   : > { %v1627_v48 = vrot.slane %v1619_v43, %v4665_v39  ;;  %v1634_v49 = vrot.slane %v1620_v44, %v4665_v39  ;;  %v4208_v43 = vpack.c.bf16 %v1959_v41, %v1958_v40  ;;  %v1961_v44 = vld [vmem:[%s5078_s10 + $0x18] sm:$0xff] }
 0x5ed   : > { %v1635_v50 = vcombine.low %v1611_v46, %v1627_v48  ;;  %v1636_v51 = vcombine.high %v1611_v46, %v1627_v48  ;;  %v1651_v52 = vcombine.low %v1618_v47, %v1634_v49  ;;  %v1652_v53 = vcombine.high %v1618_v47, %v1634_v49  ;;  %4209 = vmatpush3.bf16.msra.mxu1 %v4208_v43  ;;  %v1962_v47 = vld [vmem:[%s5078_s10 + $0x20] sm:$0xff]  ;;  %v1963_v48 = vld [vmem:[%s5078_s10 + $0x28] sm:$0xff] }
 0x5ee   : > { %v4211_v46 = vpack.c.bf16 %v1961_v44, %v1960_v42  ;;  %4210 = vmatprep.subr.bf16.mxu1 %v4429_v3  ;;  %v4214_v49 = vpack.c.bf16 %v1963_v48, %v1962_v47  ;;  %v3810_v47 = vld [vmem:[%s5080_s12] ss:$0 sm:$0xff] }
 0x5ef   : > { %v1643_v56 = vrot.slane %v1635_v50, %v4667_v45  ;;  %v1650_v57 = vrot.slane %v1636_v51, %v4667_v45  ;;  %v1659_v58 = vrot.slane %v1651_v52, %v4667_v45  ;;  %v1666_v59 = vrot.slane %v1652_v53, %v4667_v45  ;;  %v1964_v50 = vld [vmem:[%s5078_s10 + $0x30] sm:$0xff]  ;;  %v1965_v51 = vld [vmem:[%s5078_s10 + $0x38] sm:$0xff]  ;;  %v1966_v53 = vld [vmem:[%s5078_s10 + $0x40] sm:$0xff] }
 0x5f0   : > { %v4217_v52 = vpack.c.bf16 %v1965_v51, %v1964_v50  ;;  %v4220_v55 = vpack.c.bf16 %v1967_v54, %v1966_v53 }
 0x5f1   : > { %v1671_v61 = vcombine.low %v1643_v56, %v1650_v57  ;;  %v3801_v62 = vcombine.high %v1643_v56, %v1650_v57  ;;  %v1687_v63 = vcombine.low %v1659_v58, %v1666_v59  ;;  %v3802_v0 = vcombine.high %v1659_v58, %v1666_v59  ;;  %4212 = vmatpush3.bf16.msra.mxu1 %v4211_v46  ;;  %v1968_v56 = vld [vmem:[%s5078_s10 + $0x50] sm:$0xff]  ;;  %v1969_v57 = vld [vmem:[%s5078_s10 + $0x58] sm:$0xff]  ;;  %v1970_v59 = vld [vmem:[%s5078_s10 + $0x60] sm:$0xff] }
 0x5f2   : > { %4213 = vmatprep.subr.bf16.mxu1 %v4429_v3  ;;  %v4223_v58 = vpack.c.bf16 %v1969_v57, %v1968_v56 }
 0x5f3   : > { %v1678_v1 = vrot.slane %v1671_v61, %v4665_v39  ;;  %v1686_v2 = vrot.slane %v3801_v62, %v4665_v39  ;;  %v1694_v4 = vrot.slane %v1687_v63, %v4665_v39  ;;  %v1702_v5 = vrot.slane %v3802_v0, %v4665_v39 }
 0x5f4   : > { %v4226_v61 = vpack.c.bf16 %v1971_v60, %v1970_v59 }
 0x5f5   : > { %v1704_v7 = vcombine.high %v1678_v1, %v1686_v2  ;;  %v1720_v8 = vcombine.high %v1694_v4, %v1702_v5  ;;  %v1703_v9 = vcombine.low %v1678_v1, %v1686_v2  ;;  %v1719_v11 = vcombine.low %v1694_v4, %v1702_v5  ;;  %4215 = vmatpush3.bf16.msra.mxu1 %v4214_v49  ;;  %v3811_v49 = vld [vmem:[%s5081_s13] ss:$0 sm:$0xff] }
 0x5f6   : > { %4216 = vmatprep.subr.bf16.mxu1 %v4429_v3 }
 0x5f7   : > { %v1718_v12 = vrot.slane %v1704_v7, %v4667_v45  ;;  %v1734_v13 = vrot.slane %v1720_v8, %v4667_v45  ;;  %v1711_v14 = vrot.slane %v1703_v9, %v4667_v45  ;;  %v1727_v15 = vrot.slane %v1719_v11, %v4667_v45  ;;  %v3805_v9 = vld [vmem:[%s5074_s6] ss:$0 sm:$0xff] }
 0x5f9   : > { %v1737_v16 = vcombine.low %v1718_v12, %v1734_v13  ;;  %v1736_v17 = vcombine.high %v1711_v14, %v1727_v15  ;;  %v1735_v18 = vcombine.low %v1711_v14, %v1727_v15  ;;  %v1738_v19 = vcombine.high %v1718_v12, %v1734_v13  ;;  %4218 = vmatpush3.bf16.msra.mxu1 %v4217_v52  ;;  %v3806_v12 = vld [vmem:[%s5075_s7] ss:$0 sm:$0xff]  ;;  %v1972_v15 = vld [vmem:[%s5078_s10 + $0x70] sm:$0xff]  ;;  %v3817_v52 = vld [vmem:[%s5103_s3 + $0x1] ss:$0 sm:$0xff] }
 0x5fa   : > { %4219 = vmatprep.subr.bf16.mxu1 %v4429_v3 }
 0x5fb   : > { %1744 = vrot.lane.b32.xlu0 %v1737_v16, %s5087_s18  ;;  %1740 = vrot.lane.b32.xlu1 %v1736_v17, %s5085_s20  ;;  %v1973_v16 = vld [vmem:[%s5078_s10 + $0x78] sm:$0xff]  ;;  %s5104_s18 = smov 112   ;;  %s5106_s20 = smov 104  }
 0x5fc   : > { %v4229_v17 = vpack.c.bf16 %v1973_v16, %v1972_v15 }
 0x5fd   : > { %4221 = vmatpush3.bf16.msra.mxu1 %v4220_v55 }
 0x5fe   : > { %4222 = vmatprep.subr.bf16.mxu1 %v4429_v3 }
 0x5ff   : > { %1748 = vrot.lane.b32.xlu1 %v1738_v19, %s5086_s21  ;;  %s5105_s21 = smov 120  }
 0x601   : > { %4224 = vmatpush3.bf16.msra.mxu1 %v4223_v58 }
 0x602   : > { %4225 = vmatprep.subr.bf16.mxu1 %v4429_v3 }
 0x605   : > { %4227 = vmatpush3.bf16.msra.mxu1 %v4226_v61 }
 0x606   : > { %4228 = vmatprep.subr.bf16.mxu1 %v4429_v3 }
 0x609   : > { %4230 = vmatpush3.bf16.msra.mxu1 %v4229_v17 }
 0x60a   : > { %4122 = vmatprep.subr.mxu1 %v4431_v6 }
 0x66d   : > { %v1741_v20 = vpop.permute.xlu1 %1740  ;;  %v1745_v21 = vpop.permute.xlu0 %1744 }
 0x66e   : > { %v1751_v22 = vsel %vm698_vm2, %v1735_v18, %v1741_v20  ;;  %v3807_v18 = vld [vmem:[%s5077_s9] ss:$0 sm:$0xff] }
 0x66f   : > { %v1753_v24 = vsel %vm1752_vm3, %v1751_v22, %v1745_v21 }
 0x671   : > { %v1749_v23 = vpop.permute.xlu1 %1748 }
 0x672   : > { %v1755_v25 = vsel %vm1754_vm4, %v1753_v24, %v1749_v23  ;;  %v3809_v23 = vld [vmem:[%s5079_s11] ss:$0 sm:$0xff] }
 0x673   : > { %4033 = vmatmul.mubr.msk.f32.vlgmr.msra.gmra.mrb[8].mxu0 %vm477_vm1, %v1755_v25 }
 0x674   : > { %4043 = vmatprep.mubr.msk.f32.mxu0 %vm4430_vm0, %v4431_v6 }
 0x746   : > { %v1836_v27 = vpop.f32.mrb[8].mxu0 }
 0x747   : > { %v1837_v28 = vadd.f32 %v3803_v26, %v1836_v27  ;;  %v4034_v29 = vpop.f32.mrb[9].mxu0 }
 0x749   : > { %v4705_v30 = vadd.f32 %v1837_v28, %v4593_v10  ;;  %v4202_v10 = vpack.c.bf16 %v1874_v35, %v1873_v34  ;;  %v3814_v34 = vld [vmem:[%s5100_s2 + $0x30] sm:$0xff]  ;;  %v3815_v35 = vld [vmem:[%s5100_s2 + $0x38] sm:$0xff] }
 0x74b   : > { %v1843_v31 = vsel %vm477_vm1, %v4705_v30, 0.0  ;;  %v1848_v32 = vmul.f32 %v4705_v30, %v4705_v30  ;;  %4203 = vmatpush3.bf16.msra.mxu0 %v4202_v10  ;;  %v4235_v10 = vpack.c.bf16 %v3815_v35, %v3814_v34 }
 0x74c   : > { %1844 = vadd.xlane.f32.xlu1 %v1843_v31  ;;  %4204 = vmatprep.subr.bf16.mxu0 %v4429_v3  ;;  %v3812_v31 = vld [vmem:[%s5100_s2 + $0x20] sm:$0xff] }
 0x74d   : > { %v1849_v33 = vsel %vm477_vm1, %v1848_v32, 0.0  ;;  %v3813_v32 = vld [vmem:[%s5100_s2 + $0x28] sm:$0xff] }
 0x74e   : > { %1850 = vadd.xlane.f32.xlu0 %v1849_v33  ;;  %v4232_v33 = vpack.c.bf16 %v3813_v32, %v3812_v31 }
 0x74f   : > { %4206 = vmatpush3.bf16.msra.mxu0 %v4205_v38 }
 0x750   : > { %4231 = vmatprep.subr.bf16.mxu0 %v4429_v3 }
 0x7d9   : > { %v1845_v62 = vpop.xlane.xlu1 %1844 }
 0x7da   : > { %v1847_v63 = vmul.f32 0.03125, %v1845_v62 }
 0x7db   : > { %v1851_v0 = vpop.xlane.xlu0 %1850 }
 0x7dc   : > { %v1853_v1 = vmul.f32 %v1847_v63, %v1847_v63  ;;  %v1852_v2 = vmul.f32 0.03125, %v1851_v0  ;;  %v1855_v7 = vsub.f32 %v4705_v30, %v1847_v63 }
 0x7de   : > { %v1854_v4 = vsub.f32 %v1852_v2, %v1853_v1 }
 0x7e0   : > { %v1856_v5 = vadd.f32 1e-05, %v1854_v4 }
 0x7e2   : > { %4341 = vrsqrt.f32 %v1856_v5 }
 0x7ec   : > { %v4342_v8 = vpop.eup %4341 }
 0x7ed   : > { %v1858_v11 = vmul.f32 %v4342_v8, %v1855_v7 }
 0x7ef   : > { %v1865_v13 = vmul.f32 %v3805_v9, %v1858_v11 }
 0x7f1   : > { %v1872_v14 = vadd.f32 %v3806_v12, %v1865_v13 }
 0x7f3   : > { %4044 = vmatmul.mubr.msk.f32.vlgmr.msra.gmra.mrb[10].mxu0 %vm477_vm1, %v1872_v14 }
 0x7f4   : > { %4089 = vmatprep.mubr.msk.f32.mxu0 %vm4430_vm0, %v4431_v6  ;;  %4233 = vmatpush3.bf16.msra.mxu0 %v4232_v33 }
 0x7f5   : > { %4234 = vmatprep.subr.bf16.mxu0 %v4429_v3 }
 0x7f8   : > { %4236 = vmatpush3.bf16.msra.mxu0 %v4235_v10 }
 0x7f9   : > { %4092 = vmatprep.subr.mxu0 %v4431_v6 }
 0x8c6   : > { %v1953_v19 = vpop.f32.mrb[10].mxu0 }
 0x8c7   : > { %v1954_v20 = vadd.f32 %v3807_v18, %v1953_v19  ;;  %v4045_v21 = vpop.f32.mrb[11].mxu0 }
 0x8c9   : > { %v1957_v22 = vmax.f32 %v1954_v20, 0.0 }
 0x8cb   : > { %4079 = vmatmul.mubr.f32.vlgmr.msra.gmra.mrb[10].mxu1 %v1957_v22 }
 0x8cc   : > { %4124 = vmatprep.mubr.msk.f32.mxu1 %vm4430_vm0, %v4431_v6 }
 0x99e   : > { %v2047_v24 = vpop.f32.mrb[10].mxu1 }
 0x99f   : > { %v2048_v25 = vadd.f32 %v3809_v23, %v2047_v24  ;;  %v4080_v26 = vpop.f32.mrb[11].mxu1 }
 0x9a1   : > { %v2051_v27 = vadd.f32 %v2048_v25, %v1872_v14 }
 0x9a3   : > { %v2054_v28 = vsel %vm477_vm1, %v2051_v27, 0.0  ;;  %v2058_v29 = vmul.f32 %v2051_v27, %v2051_v27 }
 0x9a4   : > { %2055 = vadd.xlane.f32.xlu1 %v2054_v28 }
 0x9a5   : > { %v2059_v30 = vsel %vm477_vm1, %v2058_v29, 0.0 }
 0x9a6   : > { %2060 = vadd.xlane.f32.xlu0 %v2059_v30 }
 0xa31   : > { %v2056_v36 = vpop.xlane.xlu1 %2055 }
 0xa32   : > { %v2057_v37 = vmul.f32 0.03125, %v2056_v36 }
 0xa33   : > { %v2061_v38 = vpop.xlane.xlu0 %2060 }
 0xa34   : > { %v2063_v40 = vmul.f32 %v2057_v37, %v2057_v37  ;;  %v2062_v41 = vmul.f32 0.03125, %v2061_v38  ;;  %v2065_v44 = vsub.f32 %v2051_v27, %v2057_v37 }
 0xa36   : > { %v2064_v42 = vsub.f32 %v2062_v41, %v2063_v40 }
 0xa38   : > { %v2066_v43 = vadd.f32 1e-05, %v2064_v42 }
 0xa3a   : > { %4343 = vrsqrt.f32 %v2066_v43 }
 0xa44   : > { %v4344_v46 = vpop.eup %4343 }
 0xa45   : > { %v2068_v48 = vmul.f32 %v4344_v46, %v2065_v44 }
 0xa47   : > { %v2075_v50 = vmul.f32 %v3810_v47, %v2068_v48 }
 0xa49   : > { %v4822_v51 = vadd.f32 %v3811_v49, %v2075_v50 }
 0xa4b   : > { %4090 = vmatmul.mubr.msk.f32.vlgmr.msra.gmra.mrb[12].mxu0 %vm477_vm1, %v4822_v51 }
 0xa4c   : > { %4094 = vmatprep.mubr.msk.f32.mxu0 %vm4430_vm0, %v4431_v6 }
 0xb1e   : > { %v2165_v53 = vpop.f32.mrb[12].mxu0 }
 0xb1f   : > { %v2166_v54 = vadd.f32 %v3817_v52, %v2165_v53  ;;  %v4091_v55 = vpop.f32.mrb[13].mxu0 }
 0xb21   : > { %2172 = vrot.lane.b32.xlu0 %v2166_v54, %s5104_s18  ;;  %2170 = vrot.lane.b32.xlu1 %v2166_v54, %s5105_s21  ;;  %s3785_s18 = sshll.u32 %s456_s28, 3 }
 0xb25   : > { %2174 = vrot.lane.b32.xlu1 %v2166_v54, %s5106_s20 }
 0xb29   : > { %2176 = vrot.lane.b32.xlu1 %v2166_v54, %s5107_s25 }
 0xb93   : > { %v2173_v56 = vpop.permute.xlu0 %2172  ;;  %v2171_v57 = vpop.permute.xlu1 %2170 }
 0xb94   : > { %2180 = vrot.lane.b32.xlu1 %v2173_v56, %s5107_s25  ;;  %2178 = vrot.lane.b32.xlu0 %v2171_v57, %s5107_s25 }
 0xb97   : > { %v2175_v58 = vpop.permute.xlu1 %2174 }
 0xb98   : > { %2182 = vrot.lane.b32.xlu0 %v2175_v58, %s5107_s25 }
 0xb9b   : > { %v2177_v59 = vpop.permute.xlu1 %2176 }
 0xbbd   : > { %2188 = vxpose.xlu1.b32.start.end [1/1] (short) (narrow) %v2177_v59, 8 }
 0xc06   : > { %v2179_v60 = vpop.permute.xlu0 %2178  ;;  %v2181_v61 = vpop.permute.xlu1 %2180 }
 0xc07   : > { %2220 = vxpose.xlu0.b32.start.end [1/1] (short) (narrow) %v2179_v60, 8 }
 0xc0a   : > { %v2183_v62 = vpop.permute.xlu0 %2182 }
 0xc0b   : > { %2252 = vxpose.xlu0.b32.start.end [1/1] (short) (narrow) %v2181_v61, 8 }
 0xc0f   : > { %2284 = vxpose.xlu0.b32.start.end [1/1] (short) (narrow) %v2183_v62, 8 }
 0xc3d   : > { %v2204_v63 = vpop.trf.xlu1 }
 0xc3e   : > { %4093 = vmatpush3.msra.mxu0 %v2204_v63 }
 0xc3f   : > { %4095 = vmatmul.mubr.msk.f32.vlgmr.msra.gmra.mrb[14].mxu0 %vm698_vm2, %v2166_v54  ;;  %4097 = vmatprep.subr.mxu0 %v4431_v6 }
 0xc40   : > { %4099 = vmatprep.mubr.msk.f32.mxu0 %vm4430_vm0, %v4431_v6 }
 0xc87   : > { %v2236_v0 = vpop.trf.xlu0 }
 0xc88   : > { %4098 = vmatpush3.msra.mxu0 %v2236_v0 }
 0xc89   : > { %4100 = vmatmul.mubr.msk.f32.vlgmr.msra.gmra.mrb[16].mxu0 %vm698_vm2, %v2171_v57  ;;  %4102 = vmatprep.subr.mxu0 %v4431_v6 }
 0xc8a   : > { %4104 = vmatprep.mubr.msk.f32.mxu0 %vm4430_vm0, %v4431_v6 }
 0xc8b   : > { %v2268_v1 = vpop.trf.xlu0 }
 0xc8c   : > { %4103 = vmatpush3.msra.mxu0 %v2268_v1 }
 0xc8d   : > { %4105 = vmatmul.mubr.msk.f32.vlgmr.msra.gmra.mrb[18].mxu0 %vm698_vm2, %v2173_v56  ;;  %4107 = vmatprep.subr.mxu0 %v4431_v6 }
 0xc8e   : > { %4109 = vmatprep.mubr.msk.f32.mxu0 %vm4430_vm0, %v4431_v6 }
 0xc8f   : > { %v2300_v2 = vpop.trf.xlu0 }
 0xc90   : > { %4108 = vmatpush3.msra.mxu0 %v2300_v2 }
 0xc91   : > { %4110 = vmatmul.mubr.msk.f32.vlgmr.msra.gmra.mrb[20].mxu0 %vm698_vm2, %v2175_v58  ;;  %4112 = vmatprep.subr.mxu0 %v4431_v6 }
 0xc92   : > { %4114 = vmatprep.mubr.msk.f32.mxu0 %vm4430_vm0, %v4431_v6 }
 0xd12   : > { %v2384_v4 = vpop.f32.mrb[14].mxu0 }
 0xd13   : > { %v4096_v5 = vpop.f32.mrb[15].mxu0  ;;  %v2604_v7 = vsel %vm698_vm2, %v2384_v4, -inf }
 0xd14   : > { %2605 = vmax.xlane.f32.xlu1 %v2604_v7  ;;  %v3833_v5 = vld [vmem:[%s5072_s4 + $0x20] sm:$0xff]  ;;  %v3834_v7 = vld [vmem:[%s5072_s4 + $0x28] sm:$0xff] }
 0xd5c   : > { %v2456_v8 = vpop.f32.mrb[16].mxu0 }
 0xd5d   : > { %v4101_v9 = vpop.f32.mrb[17].mxu0  ;;  %v2607_v11 = vsel %vm698_vm2, %v2456_v8, -inf }
 0xd5e   : > { %2608 = vmax.xlane.f32.xlu0 %v2607_v11 }
 0xd60   : > { %v2528_v12 = vpop.f32.mrb[18].mxu0 }
 0xd61   : > { %v4106_v13 = vpop.f32.mrb[19].mxu0  ;;  %v2610_v14 = vsel %vm698_vm2, %v2528_v12, -inf }
 0xd62   : > { %2611 = vmax.xlane.f32.xlu1 %v2610_v14 }
 0xd64   : > { %v2600_v15 = vpop.f32.mrb[20].mxu0 }
 0xd65   : > { %v4111_v16 = vpop.f32.mrb[21].mxu0  ;;  %v2613_v17 = vsel %vm698_vm2, %v2600_v15, -inf }
 0xd66   : > { %2614 = vmax.xlane.f32.xlu1 %v2613_v17 }
 0xd74   : > { %2648 = vrot.lane.b32.xlu0 %v2166_v54, %s5108_s26 }
 0xd77   : > { %2650 = vrot.lane.b32.xlu1 %v2171_v57, %s5108_s26 }
 0xd78   : > { %2652 = vrot.lane.b32.xlu0 %v2173_v56, %s5108_s26 }
 0xd7c   : > { %2654 = vrot.lane.b32.xlu0 %v2175_v58, %s5108_s26  ;;  %s5109_s26 = smov 16  }
 0xda1   : > { %v2606_v18 = vpop.xlane.xlu1 %2605 }
 0xda2   : > { %v2616_v19 = vsub.f32 %v2384_v4, %v2606_v18 }
 0xda4   : > { %v2620_v20 = vmul.f32 1.442695, %v2616_v19 }
 0xda6   : > { %4345 = vpow2.f32 %v2620_v20 }
 0xdb0   : > { %v4346_v21 = vpop.eup %4345 }
 0xdb1   : > { %v2628_v22 = vsel %vm698_vm2, %v4346_v21, 0.0 }
 0xdb2   : > { %2629 = vadd.xlane.f32.xlu1 %v2628_v22 }
 0xdeb   : > { %v2609_v23 = vpop.xlane.xlu0 %2608 }
 0xdec   : > { %v2617_v24 = vsub.f32 %v2456_v8, %v2609_v23  ;;  %v4238_v8 = vpack.c.bf16 %v3834_v7, %v3833_v5  ;;  %v3847_v7 = vld [vmem:[%s5076_s8 + $0x38] sm:$0xff] }
 0xdee   : > { %v2622_v25 = vmul.f32 1.442695, %v2617_v24 }
 0xdef   : > { %v2612_v26 = vpop.xlane.xlu1 %2611  ;;  %v2649_v37 = vpop.permute.xlu0 %2648 }
 0xdf0   : > { %4347 = vpow2.f32 %v2622_v25  ;;  %v2618_v27 = vsub.f32 %v2528_v12, %v2612_v26  ;;  %v3835_v26 = vld [vmem:[%s5072_s4 + $0x30] sm:$0xff] }
 0xdf2   : > { %v2624_v28 = vmul.f32 1.442695, %v2618_v27  ;;  %v3836_v27 = vld [vmem:[%s5072_s4 + $0x38] sm:$0xff] }
 0xdf3   : > { %v2615_v29 = vpop.xlane.xlu1 %2614  ;;  %v2653_v38 = vpop.permute.xlu0 %2652 }
 0xdf4   : > { %4349 = vpow2.f32 %v2624_v28  ;;  %v2619_v30 = vsub.f32 %v2600_v15, %v2615_v29 }
 0xdf6   : > { %v2626_v31 = vmul.f32 1.442695, %v2619_v30 }
 0xdf7   : > { %v2655_v40 = vpop.permute.xlu0 %2654  ;;  %v2651_v41 = vpop.permute.xlu1 %2650 }
 0xdf8   : > { %4351 = vpow2.f32 %v2626_v31 }
 0xdfa   : > { %v4348_v32 = vpop.eup %4347 }
 0xdfb   : > { %v2631_v33 = vsel %vm698_vm2, %v4348_v32, 0.0 }
 0xdfc   : > { %2632 = vadd.xlane.f32.xlu0 %v2631_v33 }
 0xdfe   : > { %v4350_v34 = vpop.eup %4349 }
 0xdff   : > { %v2634_v35 = vsel %vm698_vm2, %v4350_v34, 0.0 }
 0xe00   : > { %2635 = vadd.xlane.f32.xlu1 %v2634_v35 }
 0xe02   : > { %v4352_v10 = vpop.eup %4351 }
 0xe03   : > { %v2637_v36 = vsel %vm698_vm2, %v4352_v10, 0.0 }
 0xe04   : > { %2638 = vadd.xlane.f32.xlu1 %v2637_v36 }
 0xe29   : > { %2660 = vxpose.xlu0.b32.start.end [1/1] (short) (narrow) %v2649_v37, 8 }
 0xe2d   : > { %2724 = vxpose.xlu0.b32.start.end [1/1] (short) (narrow) %v2653_v38, 8 }
 0xe31   : > { %2756 = vxpose.xlu0.b32.start.end [1/1] (short) (narrow) %v2655_v40, 8 }
 0xe37   : > { %2692 = vxpose.xlu1.b32.start.end [1/1] (short) (narrow) %v2651_v41, 8 }
 0xe3f   : > { %v2630_v42 = vpop.xlane.xlu1 %2629 }
 0xe40   : > { %4353 = vrcp.f32 %v2630_v42 }
 0xe4a   : > { %v4354_v43 = vpop.eup %4353 }
 0xe4b   : > { %v2644_v44 = vmul.f32 %v4354_v43, %v4346_v21 }
 0xe4d   : > { %4113 = vmatpush3.xpose.msk.msra.mxu0 %vm698_vm2, %v2644_v44 }
 0xe4e   : > { %4117 = vmatprep.subr.mxu0 %v4431_v6 }
 0xe89   : > { %v2633_v48 = vpop.xlane.xlu0 %2632 }
 0xe8d   : > { %v2636_v46 = vpop.xlane.xlu1 %2635 }
 0xe8e   : > { %4355 = vrcp.f32 %v2636_v46 }
 0xe8f   : > { %4357 = vrcp.f32 %v2633_v48 }
 0xe91   : > { %v2639_v52 = vpop.xlane.xlu1 %2638 }
 0xe92   : > { %4359 = vrcp.f32 %v2639_v52 }
 0xe98   : > { %v4356_v47 = vpop.eup %4355 }
 0xe99   : > { %v2646_v49 = vmul.f32 %v4356_v47, %v4350_v34  ;;  %v4358_v50 = vpop.eup %4357 }
 0xe9a   : > { %v2645_v53 = vmul.f32 %v4358_v50, %v4348_v32  ;;  %v4241_v32 = vpack.c.bf16 %v3836_v27, %v3835_v26  ;;  %v3862_v26 = vld [vmem:[%s5078_s10 + $0xd8] sm:$0xff] }
 0xe9b   : > { %4123 = vmatpush3.xpose.msk.msra.mxu1 %vm698_vm2, %v2646_v49 }
 0xe9c   : > { %4249 = vmatprep.subr.bf16.mxu1 %v4429_v3  ;;  %v4360_v56 = vpop.eup %4359 }
 0xe9d   : > { %v2647_v57 = vmul.f32 %v4360_v56, %v4352_v10 }
 0xea9   : > { %v2676_v54 = vpop.trf.xlu0 }
 0xeaa   : > { %4115 = vmatmul.mubr.msk.f32.vlgmr.msra.gmra.mrb[22].mxu0 %vm698_vm2, %v2676_v54 }
 0xeab   : > { %4118 = vmatpush3.xpose.msk.msra.mxu0 %vm698_vm2, %v2645_v53  ;;  %4119 = vmatprep.mubr.msk.f32.mxu0 %vm4430_vm0, %v4431_v6 }
 0xeac   : > { %4127 = vmatprep.subr.mxu0 %v4431_v6 }
 0xead   : > { %v2740_v55 = vpop.trf.xlu0 }
 0xeae   : > { %4125 = vmatmul.mubr.msk.f32.vlgmr.msra.gmra.mrb[12].mxu1 %vm698_vm2, %v2740_v55 }
 0xeaf   : > { %4186 = vmatprep.mubr.msk.f32.mxu1 %vm4430_vm0, %v4431_v6 }
 0xeb1   : > { %v2772_v59 = vpop.trf.xlu0 }
 0xeb7   : > { %v2708_v58 = vpop.trf.xlu1 }
 0xeb8   : > { %4120 = vmatmul.mubr.msk.f32.vlgmr.msra.gmra.mrb[24].mxu0 %vm698_vm2, %v2708_v58 }
 0xeb9   : > { %4128 = vmatpush3.xpose.msk.msra.mxu0 %vm698_vm2, %v2647_v57  ;;  %4129 = vmatprep.mubr.msk.f32.mxu0 %vm4430_vm0, %v4431_v6 }
 0xeba   : > { %4237 = vmatprep.subr.bf16.mxu0 %v4429_v3 }
 0xebc   : > { %4130 = vmatmul.mubr.msk.f32.vlgmr.msra.gmra.mrb[26].mxu0 %vm698_vm2, %v2772_v59 }
 0xebd   : > { %4140 = vmatprep.mubr.msk.f32.mxu0 %vm4430_vm0, %v4431_v6  ;;  %4239 = vmatpush3.bf16.msra.mxu0 %v4238_v8 }
 0xebe   : > { %4240 = vmatprep.subr.bf16.mxu0 %v4429_v3 }
 0xec1   : > { %4242 = vmatpush3.bf16.msra.mxu0 %v4241_v32 }
 0xec2   : > { %4243 = vmatprep.subr.bf16.mxu0 %v4429_v3 }
 0xf7d   : > { %v2860_v60 = vpop.f32.mrb[22].mxu0 }
 0xf7e   : > { %v4116_v61 = vpop.f32.mrb[23].mxu0  ;;  %3092 = vxpose.xlu1.b32.start.end [1/1] (short) (narrow) %v2860_v60, 8 }
 0xf81   : > { %v3012_v62 = vpop.f32.mrb[12].mxu1 }
 0xf82   : > { %v4126_v63 = vpop.f32.mrb[13].mxu1  ;;  %3156 = vxpose.xlu1.b32.start.end [1/1] (short) (narrow) %v3012_v62, 8 }
 0xf8b   : > { %v2936_v0 = vpop.f32.mrb[24].mxu0 }
 0xf8c   : > { %3124 = vxpose.xlu0.b32.start.end [1/1] (short) (narrow) %v2936_v0, 8  ;;  %v4121_v1 = vpop.f32.mrb[25].mxu0 }
 0xf8f   : > { %v3088_v2 = vpop.f32.mrb[26].mxu0 }
 0xf90   : > { %3188 = vxpose.xlu0.b32.start.end [1/1] (short) (narrow) %v3088_v2, 8  ;;  %v4131_v4 = vpop.f32.mrb[27].mxu0 }
 0xf91   : > { %v3845_v4 = vld [vmem:[%s5076_s8 + $0x28] sm:$0xff] }
 0xffe   : > { %v3108_v9 = vpop.trf.xlu1 }
0x1002   : > { %v3172_v12 = vpop.trf.xlu1 }
0x1003   : > { %v3220_v13 = vcombine.low %v3108_v9, %v3172_v12  ;;  %v3221_v14 = vcombine.high %v3108_v9, %v3172_v12  ;;  %v3851_v9 = vld [vmem:[%s5078_s10 + $0x80] sm:$0xff]  ;;  %v3853_v12 = vld [vmem:[%s5078_s10 + $0x90] sm:$0xff] }
0x1005   : > { %v3228_v18 = vrot.slane %v3220_v13, %v4665_v39  ;;  %v3235_v19 = vrot.slane %v3221_v14, %v4665_v39  ;;  %v3854_v14 = vld [vmem:[%s5078_s10 + $0x98] sm:$0xff] }
0x100c   : > { %v3140_v11 = vpop.trf.xlu0 }
0x1010   : > { %v3204_v15 = vpop.trf.xlu0 }
0x1011   : > { %v3236_v16 = vcombine.low %v3140_v11, %v3204_v15  ;;  %v3237_v17 = vcombine.high %v3140_v11, %v3204_v15  ;;  %v3852_v11 = vld [vmem:[%s5078_s10 + $0x88] sm:$0xff]  ;;  %v4253_v15 = vpack.c.bf16 %v3854_v14, %v3853_v12 }
0x1012   : > { %v4250_v13 = vpack.c.bf16 %v3852_v11, %v3851_v9 }
0x1013   : > { %v3244_v20 = vrot.slane %v3236_v16, %v4665_v39  ;;  %v3251_v21 = vrot.slane %v3237_v17, %v4665_v39  ;;  %v3855_v16 = vld [vmem:[%s5078_s10 + $0xa0] sm:$0xff]  ;;  %v3856_v17 = vld [vmem:[%s5078_s10 + $0xa8] sm:$0xff] }
0x1014   : > { %4251 = vmatpush3.bf16.msra.mxu1 %v4250_v13 }
0x1015   : > { %v3252_v22 = vcombine.low %v3228_v18, %v3244_v20  ;;  %v3253_v23 = vcombine.high %v3228_v18, %v3244_v20  ;;  %v3268_v24 = vcombine.low %v3235_v19, %v3251_v21  ;;  %v3269_v25 = vcombine.high %v3235_v19, %v3251_v21  ;;  %4252 = vmatprep.subr.bf16.mxu1 %v4429_v3  ;;  %v3857_v19 = vld [vmem:[%s5078_s10 + $0xb0] sm:$0xff]  ;;  %v3858_v20 = vld [vmem:[%s5078_s10 + $0xb8] sm:$0xff] }
0x1016   : > { %v4256_v18 = vpack.c.bf16 %v3856_v17, %v3855_v16  ;;  %v4259_v21 = vpack.c.bf16 %v3858_v20, %v3857_v19 }
0x1017   : > { %v3260_v28 = vrot.slane %v3252_v22, %v4667_v45  ;;  %v3267_v29 = vrot.slane %v3253_v23, %v4667_v45  ;;  %v3276_v30 = vrot.slane %v3268_v24, %v4667_v45  ;;  %v3283_v31 = vrot.slane %v3269_v25, %v4667_v45  ;;  %v3859_v22 = vld [vmem:[%s5078_s10 + $0xc0] sm:$0xff]  ;;  %v3860_v23 = vld [vmem:[%s5078_s10 + $0xc8] sm:$0xff]  ;;  %v3861_v25 = vld [vmem:[%s5078_s10 + $0xd0] sm:$0xff] }
0x1018   : > { %4254 = vmatpush3.bf16.msra.mxu1 %v4253_v15  ;;  %v4262_v24 = vpack.c.bf16 %v3860_v23, %v3859_v22  ;;  %v4265_v27 = vpack.c.bf16 %v3862_v26, %v3861_v25 }
0x1019   : > { %v3288_v33 = vcombine.low %v3260_v28, %v3267_v29  ;;  %v3831_v34 = vcombine.high %v3260_v28, %v3267_v29  ;;  %v3304_v35 = vcombine.low %v3276_v30, %v3283_v31  ;;  %v3832_v10 = vcombine.high %v3276_v30, %v3283_v31  ;;  %4255 = vmatprep.subr.bf16.mxu1 %v4429_v3  ;;  %v3863_v28 = vld [vmem:[%s5078_s10 + $0xe0] sm:$0xff]  ;;  %v3864_v29 = vld [vmem:[%s5078_s10 + $0xe8] sm:$0xff] }
0x101a   : > { %v4268_v30 = vpack.c.bf16 %v3864_v29, %v3863_v28 }
0x101b   : > { %v3295_v36 = vrot.slane %v3288_v33, %v4665_v39  ;;  %v3303_v37 = vrot.slane %v3831_v34, %v4665_v39  ;;  %v3311_v38 = vrot.slane %v3304_v35, %v4665_v39  ;;  %v3319_v40 = vrot.slane %v3832_v10, %v4665_v39 }
0x101c   : > { %4257 = vmatpush3.bf16.msra.mxu1 %v4256_v18 }
0x101d   : > { %v3321_v41 = vcombine.high %v3295_v36, %v3303_v37  ;;  %v3337_v42 = vcombine.high %v3311_v38, %v3319_v40  ;;  %v3320_v43 = vcombine.low %v3295_v36, %v3303_v37  ;;  %v3336_v44 = vcombine.low %v3311_v38, %v3319_v40  ;;  %4258 = vmatprep.subr.bf16.mxu1 %v4429_v3  ;;  %v3842_v40 = vld [vmem:[%s5074_s6 + $0x1] ss:$0 sm:$0xff] }
0x101f   : > { %v3335_v46 = vrot.slane %v3321_v41, %v4667_v45  ;;  %v3351_v47 = vrot.slane %v3337_v42, %v4667_v45  ;;  %v3328_v48 = vrot.slane %v3320_v43, %v4667_v45  ;;  %v3344_v49 = vrot.slane %v3336_v44, %v4667_v45  ;;  %v3838_v45 = vld [vmem:[%s5073_s5 + $0x1] ss:$0 sm:$0xff]  ;;  %v3865_v44 = vld [vmem:[%s5078_s10 + $0xf0] sm:$0xff] }
0x1020   : > { %4260 = vmatpush3.bf16.msra.mxu1 %v4259_v21  ;;  %v3843_v42 = vld [vmem:[%s5075_s7 + $0x1] ss:$0 sm:$0xff] }
0x1021   : > { %v3354_v50 = vcombine.low %v3335_v46, %v3351_v47  ;;  %v3353_v52 = vcombine.high %v3328_v48, %v3344_v49  ;;  %v3352_v53 = vcombine.low %v3328_v48, %v3344_v49  ;;  %v3355_v39 = vcombine.high %v3335_v46, %v3351_v47  ;;  %4261 = vmatprep.subr.bf16.mxu1 %v4429_v3  ;;  %v3866_v46 = vld [vmem:[%s5078_s10 + $0xf8] sm:$0xff]  ;;  %v3849_v48 = vld [vmem:[%s5077_s9 + $0x1] ss:$0 sm:$0xff] }
0x1022   : > { %v4271_v47 = vpack.c.bf16 %v3866_v46, %v3865_v44 }
0x1023   : > { %3361 = vrot.lane.b32.xlu0 %v3354_v50, %s5109_s26  ;;  %3357 = vrot.lane.b32.xlu1 %v3353_v52, %s5110_s22  ;;  %s3874_s26 = sshll.u32 %s4539_s17, 7  ;;  %s458_s22 = scalar_lea.vmem [#allocation2], %s3785_s18 }
0x1024   : > { %4263 = vmatpush3.bf16.msra.mxu1 %v4262_v24  ;;  %s5025_s3 = scalar_lea.hbm %s5082_s14, %s3874_s26  ;;  %s4442_s17 = smov [#allocation2]  }
0x1025   : > { %4264 = vmatprep.subr.bf16.mxu1 %v4429_v3  ;;  %s4369_s18 = sshll.u32 %s4442_s17, 4  ;;  %s4370_s18 = int_to_ptr.vmem [resolvable:$false] %s4369_s18 }
0x1026   : > { %s4371_s20 = scalar_lea.vmem %s4370_s18, 256 }
0x1027   : > { %3365 = vrot.lane.b32.xlu1 %v3355_v39, %s5111_s27  ;;  %v3868_v39 = vld [vmem:[%s5079_s11 + $0x1] ss:$0 sm:$0xff]  ;;  %s3722_s27 = sshll.u32 %s458_s22, 4  ;;  %s5027_s27 = int_to_ptr.vmem [resolvable:$true] %s3722_s27 }
0x1028   : > { %4266 = vmatpush3.bf16.msra.mxu1 %v4265_v27  ;;  %s4365_s21 = scalar_lea.vmem %s5027_s27, 128  ;;  %p4372_p0 = scmp.lt.s32.totalorder %s5027_s27, %s4370_s18 }
0x1029   : > { %4267 = vmatprep.subr.bf16.mxu1 %v4429_v3  ;;  %p4366_p11 = scmp.ne.s32.totalorder %s5027_s27, %s4365_s21  ;;  %p4373_p1 = scmp.lt.s32.totalorder %s4371_s20, %s4365_s21 }
0x102b   : > { %p4367_p12 = pnand %p4366_p11, %p4556_p5  ;;  %p4374_p2 = por %p4373_p1, %p4372_p0 }
0x102c   : > { %4269 = vmatpush3.bf16.msra.mxu1 %v4268_v30 }
0x102d   : > { %4270 = vmatprep.subr.bf16.mxu1 %v4429_v3  ;;  %p4368_p13 = pneg %p4367_p12 }
0x102f   : > { %p4375_p3 = pnand %p4374_p2, %p4368_p13 }
0x1030   : > { %4272 = vmatpush3.bf16.msra.mxu1 %v4271_v47 }
0x1095   : > { %v3358_v54 = vpop.permute.xlu1 %3357  ;;  %v3362_v55 = vpop.permute.xlu0 %3361 }
0x1096   : > { %v3368_v56 = vsel %vm698_vm2, %v3352_v53, %v3358_v54 }
0x1097   : > { %v3369_v58 = vsel %vm1752_vm3, %v3368_v56, %v3362_v55 }
0x1099   : > { %v3366_v57 = vpop.permute.xlu1 %3365 }
0x109a   : > { %v3370_v59 = vsel %vm1754_vm4, %v3369_v58, %v3366_v57 }
0x109b   : > { %4141 = vmatmul.mubr.msk.f32.vlgmr.msra.gmra.mrb[28].mxu0 %vm477_vm1, %v3370_v59 }
0x109c   : > { %4151 = vmatprep.mubr.msk.f32.mxu0 %vm4430_vm0, %v4431_v6  ;;  %v3844_v6 = vld [vmem:[%s5076_s8 + $0x20] sm:$0xff] }
0x109d   : > { %v4244_v5 = vpack.c.bf16 %v3845_v4, %v3844_v6 }
0x109f   : > { %4245 = vmatpush3.bf16.msra.mxu0 %v4244_v5  ;;  %v3871_v5 = vld [vmem:[%s5080_s12 + $0x1] ss:$0 sm:$0xff] }
0x10a0   : > { %4246 = vmatprep.subr.bf16.mxu0 %v4429_v3 }
0x116e   : > { %v3453_v60 = vpop.f32.mrb[28].mxu0 }
0x116f   : > { %v3454_v61 = vadd.f32 %v3838_v45, %v3453_v60  ;;  %v4142_v62 = vpop.f32.mrb[29].mxu0 }
0x1171   : > { %v3457_v63 = vadd.f32 %v3454_v61, %v4822_v51  ;;  %v3846_v51 = vld [vmem:[%s5076_s8 + $0x30] sm:$0xff] }
0x1172   : > { %v4247_v8 = vpack.c.bf16 %v3847_v7, %v3846_v51  ;;  %v3872_v7 = vld [vmem:[%s5081_s13 + $0x1] ss:$0 sm:$0xff] }
0x1173   : > { %v3462_v0 = vsel %vm477_vm1, %v3457_v63, 0.0  ;;  %v3466_v1 = vmul.f32 %v3457_v63, %v3457_v63 }
0x1174   : > { %3463 = vadd.xlane.f32.xlu1 %v3462_v0  ;;  %4248 = vmatpush3.bf16.msra.mxu0 %v4247_v8 }
0x1175   : > { %v3467_v2 = vsel %vm477_vm1, %v3466_v1, 0.0 }
0x1176   : > { %3468 = vadd.xlane.f32.xlu0 %v3467_v2 }
0x1201   : > { %v3464_v31 = vpop.xlane.xlu1 %3463 }
0x1202   : > { %v3465_v32 = vmul.f32 0.03125, %v3464_v31 }
0x1203   : > { %v3469_v33 = vpop.xlane.xlu0 %3468 }
0x1204   : > { %v3471_v34 = vmul.f32 %v3465_v32, %v3465_v32  ;;  %v3470_v35 = vmul.f32 0.03125, %v3469_v33  ;;  %v3473_v37 = vsub.f32 %v3457_v63, %v3465_v32 }
0x1206   : > { %v3472_v10 = vsub.f32 %v3470_v35, %v3471_v34 }
0x1208   : > { %v3474_v36 = vadd.f32 1e-05, %v3472_v10 }
0x120a   : > { %4361 = vrsqrt.f32 %v3474_v36 }
0x1214   : > { %v4362_v38 = vpop.eup %4361 }
0x1215   : > { %v3476_v41 = vmul.f32 %v4362_v38, %v3473_v37 }
0x1217   : > { %v3483_v3 = vmul.f32 %v3842_v40, %v3476_v41 }
0x1219   : > { %v3490_v43 = vadd.f32 %v3843_v42, %v3483_v3 }
0x121b   : > { %4152 = vmatmul.mubr.msk.f32.vlgmr.msra.gmra.mrb[30].mxu0 %vm477_vm1, %v3490_v43 }
0x12ee   : > { %v3573_v49 = vpop.f32.mrb[30].mxu0 }
0x12ef   : > { %v3574_v50 = vadd.f32 %v3849_v48, %v3573_v49  ;;  %v4153_v52 = vpop.f32.mrb[31].mxu0 }
0x12f1   : > { %v3577_v53 = vmax.f32 %v3574_v50, 0.0 }
0x12f3   : > { %4187 = vmatmul.mubr.f32.vlgmr.msra.gmra.mrb[14].mxu1 %v3577_v53 }
0x13c6   : > { %v3669_v54 = vpop.f32.mrb[14].mxu1 }
0x13c7   : > { %v3670_v55 = vadd.f32 %v3868_v39, %v3669_v54  ;;  %v4188_v56 = vpop.f32.mrb[15].mxu1 }
0x13c9   : > { %v3673_v57 = vadd.f32 %v3670_v55, %v3490_v43 }
0x13cb   : > { %v3678_v58 = vsel %vm477_vm1, %v3673_v57, 0.0  ;;  %v3682_v59 = vmul.f32 %v3673_v57, %v3673_v57 }
0x13cc   : > { %3679 = vadd.xlane.f32.xlu1 %v3678_v58 }
0x13cd   : > { %v3683_v45 = vsel %vm477_vm1, %v3682_v59, 0.0 }
0x13ce   : > { %3684 = vadd.xlane.f32.xlu0 %v3683_v45 }
0x1459   : > { %v3680_v60 = vpop.xlane.xlu1 %3679 }
0x145a   : > { %v3681_v61 = vmul.f32 0.03125, %v3680_v60 }
0x145b   : > { %v3685_v62 = vpop.xlane.xlu0 %3684 }
0x145c   : > { %v3687_v63 = vmul.f32 %v3681_v61, %v3681_v61  ;;  %v3686_v0 = vmul.f32 0.03125, %v3685_v62  ;;  %v3689_v6 = vsub.f32 %v3673_v57, %v3681_v61 }
0x145e   : > { %v3688_v1 = vsub.f32 %v3686_v0, %v3687_v63 }
0x1460   : > { %v3690_v2 = vadd.f32 1e-05, %v3688_v1 }
0x1462   : > { %4363 = vrsqrt.f32 %v3690_v2 }
0x146c   : > { %v4364_v4 = vpop.eup %4363 }
0x146d   : > { %v3692_v51 = vmul.f32 %v4364_v4, %v3689_v6 }
0x146f   : > { %v3699_v8 = vmul.f32 %v3871_v5, %v3692_v51 }
0x1471   : > { %v3706_v9 = vadd.f32 %v3872_v7, %v3699_v8 }
0x1473   : > { %3707 = vst.msk [vmem:[%s458_s22] sm:$0xff] %vm477_vm1, %v3706_v9 }
0x1474   : > { %4378 = shalt.err (!%p4375_p3)
}
0x1475   : > { %s4379_s2 = scalar_lea.hbm %s5025_s3, 128  ;;  %s4383_s26 = scalar_lea.hbm %s5082_s14, 256 }
0x1476   : > { %p4380_p4 = scmp.ne.s32.totalorder %s5025_s3, %s4379_s2  ;;  %p4384_p9 = scmp.lt.u32.totalorder %s5025_s3, %s5082_s14 }
0x1477   : > { %p4385_p10 = scmp.lt.u32.totalorder %s4383_s26, %s4379_s2  ;;  %p4387_p12 = scmp.lt.u32.totalorder %s4379_s2, %s5025_s3 }
0x1478   : > { %p4381_p7 = pnand %p4380_p4, %p4556_p5 }
0x1479   : > { %p4386_p11 = por %p4385_p10, %p4384_p9 }
0x147a   : > { %p4382_p8 = pneg %p4381_p7 }
0x147b   : > { %p4388_p13 = por %p4387_p12, %p4386_p11 }
0x147d   : > { %p4389_p0 = pnand %p4388_p13, %p4382_p8 }
0x147f   : > { %4392 = shalt.err (!%p4389_p0)
}
0x1480   : > { %4273 = dma.vmem_to_hbm [thread:$0]  (%p4556_p5), %s5027_s27, 128, %s5025_s3, %s3709_s1  }
0x1481 PF: > { %p4279_p1 = scmp.ge.s32.totalorder %s4427_s16, 2  ;;  %s3734_s21 = sand.u32 1, %s4415_s29  }
0x1482   : > { %s3735_s17 = scalar_lea.sflag [#allocation3], %s3734_s21 }
0x1483   : > { %p4276_p2 = pnand %p4279_p1, %p4560_p6 }
0x1485   : > { %4410 = dma.done.wait (!%p4276_p2), %s3735_s17, 128  }
0x1486   : > { %4412 = vsyncadd (!%p4276_p2), %s3735_s17, 4294967168  ;;  %s5112_s18 = sld [smem:[#allocation5_spill]]  ;;  %p24_p3 = scmp.ge.s32.totalorder %s4543_s19, 4  }
0x1487   : > { %s5113_s29 = smov %s4419_s30  ;;  %s5114_s30 = smov %s4423_s15 }
0x1488   : > { %s5116_s16 = smov %s4543_s19  ;;  %26 = sbr.rel (!%p24_p3) target bundleno = 8 (0x8), region = 123 }
0x148c   : > { %s5115_s15 = smov %s5112_s18 }
0x148f   :  { %3740 = vsyncpa [#allocation3], 1 }
0x1490   :  { %3742 = vsyncpa [#allocation3 + $0x1], 1 }

</bundles_post_ra>
